<compile_context>
chip_gen: v7x
topology: tpu7x:2x2x1
jax: 0.10.0
libtpu: 0.0.40
codegen_flags: <defaults>
</compile_context>

<pallas_src>
import jax
import jax.numpy as jnp
from jax.experimental import pallas as pl
from jax.experimental.pallas import tpu as pltpu


LANE = 128


def round_up(n, m):
    return ((n + m - 1) // m) * m


def _pad_to(a, shape):
    pads = [(0, t - s) for s, t in zip(a.shape, shape)]
    return jnp.pad(a, pads)


def dsconv_se_kernel(x_ref, dww_ref, bn1s_ref, bn1b_ref, pww_ref,
                     bn2s_ref, bn2b_ref, fc1w_ref, fc1b_ref, fc2w_ref,
                     fc2b_ref, out_ref, xp_ref):
    H = out_ref.shape[1]
    W = out_ref.shape[2]
    Cpi = x_ref.shape[3]
    Cpo = out_ref.shape[3]

    # --- build the 1-pixel zero halo in VMEM (replaces wrapper-side jnp.pad) ---
    xp_ref[...] = jnp.zeros_like(xp_ref)
    xp_ref[1:H + 1, 1:W + 1, :] = x_ref[0]

    # --- depthwise 3x3 conv, stride 1, pad 1 (f32 VPU) ---
    dww = dww_ref[...]                                       # (9, Cpi), hoisted
    acc = jnp.zeros((H, W, Cpi), jnp.float32)
    for ky in range(3):
        for kx in range(3):
            acc = acc + xp_ref[ky:ky + H, kx:kx + W, :] * dww[ky * 3 + kx]

    # --- BN1 (folded) + ReLU; padded lanes (scale=bias=0) stay exactly 0 ---
    y = jnp.maximum(acc * bn1s_ref[0] + bn1b_ref[0], 0.0)

    # --- pointwise 1x1 conv: lane-dense MXU matmul, bf16 in / f32 accumulate ---
    y2 = jnp.dot(y.reshape(H * W, Cpi).astype(jnp.bfloat16), pww_ref[...],
                 preferred_element_type=jnp.float32)         # (H*W, Cpo)

    # --- BN2 (folded) + ReLU ---
    y2 = jnp.maximum(y2 * bn2s_ref[0] + bn2b_ref[0], 0.0)

    # --- SE: global avg pool -> FC -> ReLU -> FC -> sigmoid -> scale ---
    pooled = jnp.mean(y2, axis=0, keepdims=True)             # (1, Cpo)
    # Tiny FCs on the VPU/XLU (avoid M=1 MXU passes).
    h = jnp.maximum(
        jnp.sum(fc1w_ref[...] * pooled, axis=1, keepdims=True) + fc1b_ref[...],
        0.0)                                                 # (Crp, 1)
    s = jax.nn.sigmoid(
        jnp.sum(h * fc2w_ref[...], axis=0, keepdims=True) + fc2b_ref[...])

    out_ref[...] = (y2 * s).reshape(1, H, W, Cpo)


def dsconv_block_nhwc(x_nhwc, pparams):
    """x_nhwc: (B, H, W, Cpi) f32 with channels already lane-padded.

    Returns (B, H, W, Cpo) f32 (lane-padded channels, real channels first).
    """
    (dw_w, bn1_s, bn1_b, pw_w, bn2_s, bn2_b,
     fc1_w, fc1_b, fc2_w, fc2_b) = pparams
    B, H, W, Cpi = x_nhwc.shape
    Cpo = pw_w.shape[1]
    Crp = fc1_w.shape[0]

    full2 = lambda b: (0, 0)

    return pl.pallas_call(
        dsconv_se_kernel,
        out_shape=jax.ShapeDtypeStruct((B, H, W, Cpo), jnp.float32),
        grid_spec=pltpu.PrefetchScalarGridSpec(
            num_scalar_prefetch=0,
            grid=(B,),
            in_specs=[
                pl.BlockSpec((1, H, W, Cpi), lambda b: (b, 0, 0, 0)),
                pl.BlockSpec((9, Cpi), full2),       # depthwise weights
                pl.BlockSpec((1, Cpi), full2),       # bn1 scale (folded)
                pl.BlockSpec((1, Cpi), full2),       # bn1 bias (folded)
                pl.BlockSpec((Cpi, Cpo), full2),     # pointwise weights (bf16)
                pl.BlockSpec((1, Cpo), full2),       # bn2 scale (folded)
                pl.BlockSpec((1, Cpo), full2),       # bn2 bias (folded)
                pl.BlockSpec((Crp, Cpo), full2),     # SE fc1 weight (r, c)
                pl.BlockSpec((Crp, 1), full2),       # SE fc1 bias
                pl.BlockSpec((Crp, Cpo), full2),     # SE fc2 weight (r, c)
                pl.BlockSpec((1, Cpo), full2),       # SE fc2 bias
            ],
            out_specs=pl.BlockSpec((1, H, W, Cpo), lambda b: (b, 0, 0, 0)),
            scratch_shapes=[pltpu.VMEM((H + 2, W + 2, Cpi), jnp.float32)],
        ),
        compiler_params=pltpu.CompilerParams(
            dimension_semantics=("parallel",),
            vmem_limit_bytes=32 * 1024 * 1024),
    )(x_nhwc, dw_w, bn1_s, bn1_b, pw_w, bn2_s, bn2_b,
      fc1_w, fc1_b, fc2_w, fc2_b)


def dsconv_block_nchw(x_nchw, pparams, out_channels):
    """PyTorch-compatible NCHW wrapper around the NHWC lane-padded kernel."""
    B, Cin, H, W = x_nchw.shape
    Cpi = pparams[0].shape[1]
    x = jnp.transpose(x_nchw, (0, 2, 3, 1))                          # NHWC
    x = jnp.pad(x, ((0, 0), (0, 0), (0, 0), (0, Cpi - Cin)))         # lane pad C
    out = dsconv_block_nhwc(x, pparams)                              # (B,H,W,Cpo)
    return jnp.transpose(out[..., :out_channels], (0, 3, 1, 2))      # NCHW


def make_params(key, Cin, Cout, eps=1e-5):
    """Inference-mode params in math-friendly (unpadded) layouts."""
    ks = jax.random.split(key, 12)
    # depthwise conv: torch shape (Cin, 1, 3, 3) -> (9, Cin)
    dw = jax.random.normal(ks[0], (Cin, 1, 3, 3), jnp.float32) * 0.2
    dw_w = jnp.transpose(dw.reshape(Cin, 9), (1, 0))
    # BN1 (eval mode, folded)
    g1 = 1.0 + 0.1 * jax.random.normal(ks[1], (Cin,), jnp.float32)
    b1 = 0.1 * jax.random.normal(ks[2], (Cin,), jnp.float32)
    m1 = 0.1 * jax.random.normal(ks[3], (Cin,), jnp.float32)
    v1 = 1.0 + 0.1 * jax.random.uniform(ks[4], (Cin,), jnp.float32)
    bn1_scale = (g1 / jnp.sqrt(v1 + eps)).reshape(1, Cin)
    bn1_bias = (b1 - m1 * g1 / jnp.sqrt(v1 + eps)).reshape(1, Cin)
    # pointwise conv: torch shape (Cout, Cin, 1, 1) -> (Cin, Cout)
    pw = jax.random.normal(ks[5], (Cout, Cin), jnp.float32) * 0.2
    pw_w = jnp.transpose(pw, (1, 0))
    # BN2
    g2 = 1.0 + 0.1 * jax.random.normal(ks[6], (Cout,), jnp.float32)
    b2 = 0.1 * jax.random.normal(ks[7], (Cout,), jnp.float32)
    m2 = 0.1 * jax.random.normal(ks[8], (Cout,), jnp.float32)
    v2 = 1.0 + 0.1 * jax.random.uniform(ks[9], (Cout,), jnp.float32)
    bn2_scale = (g2 / jnp.sqrt(v2 + eps)).reshape(1, Cout)
    bn2_bias = (b2 - m2 * g2 / jnp.sqrt(v2 + eps)).reshape(1, Cout)
    # SE: Linear(Cout, Cr) then Linear(Cr, Cout)
    Cr = Cout // 4
    fc1 = jax.random.normal(ks[10], (Cr, Cout), jnp.float32) * 0.3
    fc2 = jax.random.normal(ks[11], (Cout, Cr), jnp.float32) * 0.3
    fc1_w = jnp.transpose(fc1, (1, 0))          # (Cout, Cr)
    fc1_b = jnp.zeros((1, Cr), jnp.float32)
    fc2_w = jnp.transpose(fc2, (1, 0))          # (Cr, Cout)
    fc2_b = jnp.zeros((1, Cout), jnp.float32)
    return (dw_w, bn1_scale, bn1_bias, pw_w, bn2_scale, bn2_bias,
            fc1_w, fc1_b, fc2_w, fc2_b)


def pad_params(params, lane=LANE):
    """Zero-pad channels to the lane width and lay out weights for the kernel.

    Correctness of padding: padded Cin lanes have bn1 scale=bias=0 -> exactly 0
    after ReLU; padded pw_w rows/cols, bn2 params, fc1/fc2 rows/cols and biases
    are 0, so padded lanes never leak into matmul K dims or the SE pooling.
    """
    (dw_w, bn1_s, bn1_b, pw_w, bn2_s, bn2_b,
     fc1_w, fc1_b, fc2_w, fc2_b) = params
    Cin, Cout = pw_w.shape
    Cr = fc1_w.shape[1]
    Cpi, Cpo, Crp = (round_up(c, lane) for c in (Cin, Cout, Cr))
    return (
        _pad_to(dw_w, (9, Cpi)),
        _pad_to(bn1_s, (1, Cpi)),
        _pad_to(bn1_b, (1, Cpi)),
        _pad_to(pw_w, (Cpi, Cpo)).astype(jnp.bfloat16),   # bf16 MXU input
        _pad_to(bn2_s, (1, Cpo)),
        _pad_to(bn2_b, (1, Cpo)),
        _pad_to(jnp.transpose(fc1_w, (1, 0)), (Crp, Cpo)),   # (Cr, Cout)
        _pad_to(fc1_b.reshape(-1, 1), (Crp, 1)),
        _pad_to(fc2_w, (Crp, Cpo)),                          # (Cr, Cout)
        _pad_to(fc2_b, (1, Cpo)),
    )


def reference(x_nchw, params):
    """Pure-JAX reference mirroring the kernel's dtype choices (bf16 pointwise
    matmul with f32 accumulation; everything else f32)."""
    (dw_w, bn1_s, bn1_b, pw_w, bn2_s, bn2_b,
     fc1_w, fc1_b, fc2_w, fc2_b) = params
    B, Cin, H, W = x_nchw.shape
    x = jnp.transpose(x_nchw, (0, 2, 3, 1))
    xpad = jnp.pad(x, ((0, 0), (1, 1), (1, 1), (0, 0)))
    acc = jnp.zeros((B, H, W, Cin), jnp.float32)
    for ky in range(3):
        for kx in range(3):
            acc = acc + xpad[:, ky:ky + H, kx:kx + W, :] * dw_w[ky * 3 + kx]
    y = jnp.maximum(acc * bn1_s[0] + bn1_b[0], 0.0)
    y2 = jnp.einsum('bhwc,cd->bhwd', y.astype(jnp.bfloat16),
                    pw_w.astype(jnp.bfloat16),
                    preferred_element_type=jnp.float32)
    y2 = jnp.maximum(y2 * bn2_s[0] + bn2_b[0], 0.0)
    pooled = jnp.mean(y2, axis=(1, 2))                               # (B, Cout)
    h = jnp.maximum(
        jnp.matmul(pooled, fc1_w, precision=jax.lax.Precision.HIGHEST) + fc1_b,
        0.0)
    s = jax.nn.sigmoid(
        jnp.matmul(h, fc2_w, precision=jax.lax.Precision.HIGHEST) + fc2_b)
    out = y2 * s[:, None, None, :]
    return jnp.transpose(out, (0, 3, 1, 2))


if __name__ == "__main__":
    B, Cin, Cout, H, W = 2, 8, 16, 16, 16
    key = jax.random.PRNGKey(0)
    kx, kp = jax.random.split(key)
    x = jax.random.normal(kx, (B, Cin, H, W), jnp.float32)
    params = make_params(kp, Cin, Cout)
    pparams = pad_params(params)

    out = dsconv_block_nchw(x, pparams, Cout)
    out = jax.block_until_ready(out)

    ref = reference(x, params)
    assert out.shape == (B, Cout, H, W)
    max_err = float(jnp.max(jnp.abs(out - ref)))
    assert jnp.allclose(out, ref, atol=1e-3, rtol=1e-3), (
        f"mismatch vs reference, max abs err = {max_err}")
    print("KERNEL_OK")
</pallas_src>

<mosaic_0001>
module attributes {stable_mosaic.version = 11 : i64} {
  func.func @dsconv_se_kernel(%arg0: i32, %arg1: memref<1x16x16x128xf32, #tpu.memory_space<vmem>>, %arg2: memref<9x128xf32, #tpu.memory_space<vmem>>, %arg3: memref<1x128xf32, #tpu.memory_space<vmem>>, %arg4: memref<1x128xf32, #tpu.memory_space<vmem>>, %arg5: memref<128x128xbf16, #tpu.memory_space<vmem>>, %arg6: memref<1x128xf32, #tpu.memory_space<vmem>>, %arg7: memref<1x128xf32, #tpu.memory_space<vmem>>, %arg8: memref<128x128xf32, #tpu.memory_space<vmem>>, %arg9: memref<128x1xf32, #tpu.memory_space<vmem>>, %arg10: memref<128x128xf32, #tpu.memory_space<vmem>>, %arg11: memref<1x128xf32, #tpu.memory_space<vmem>>, %arg12: memref<1x16x16x128xf32, #tpu.memory_space<vmem>>, %arg13: memref<18x18x128xf32, #tpu.memory_space<vmem>>) attributes {dimension_semantics = [#tpu.dimension_semantics<parallel>], iteration_bounds = array<i64: 2>, scalar_prefetch = 0 : i64, scratch_operands = 1 : i64, tpu.core_type = #tpu.core_type<tc>, window_params = [{transform_indices = @transform_0, window_bounds = array<i64: 1, 16, 16, 128>}, {pipeline_mode = #tpu.pipeline_mode<synchronous>, transform_indices = @transform_1, window_bounds = array<i64: 9, 128>}, {pipeline_mode = #tpu.pipeline_mode<synchronous>, transform_indices = @transform_2, window_bounds = array<i64: 1, 128>}, {pipeline_mode = #tpu.pipeline_mode<synchronous>, transform_indices = @transform_3, window_bounds = array<i64: 1, 128>}, {pipeline_mode = #tpu.pipeline_mode<synchronous>, transform_indices = @transform_4, window_bounds = array<i64: 128, 128>}, {pipeline_mode = #tpu.pipeline_mode<synchronous>, transform_indices = @transform_5, window_bounds = array<i64: 1, 128>}, {pipeline_mode = #tpu.pipeline_mode<synchronous>, transform_indices = @transform_6, window_bounds = array<i64: 1, 128>}, {pipeline_mode = #tpu.pipeline_mode<synchronous>, transform_indices = @transform_7, window_bounds = array<i64: 128, 128>}, {pipeline_mode = #tpu.pipeline_mode<synchronous>, transform_indices = @transform_8, window_bounds = array<i64: 128, 1>}, {pipeline_mode = #tpu.pipeline_mode<synchronous>, transform_indices = @transform_9, window_bounds = array<i64: 128, 128>}, {pipeline_mode = #tpu.pipeline_mode<synchronous>, transform_indices = @transform_10, window_bounds = array<i64: 1, 128>}, {transform_indices = @transform_11, window_bounds = array<i64: 1, 16, 16, 128>}]} {
    %cst = arith.constant 0.000000e+00 : f32
    %0 = vector.broadcast %cst : f32 to vector<18x18x128xf32>
    %c0 = arith.constant 0 : index
    %c0_0 = arith.constant 0 : index
    %c0_1 = arith.constant 0 : index
    %1 = vector.load %arg13[%c0, %c0_0, %c0_1] : memref<18x18x128xf32, #tpu.memory_space<vmem>>, vector<18x18x128xf32>
    tpu.vector_store %arg13[%c0, %c0_0, %c0_1], %0 {strides = array<i32>} : memref<18x18x128xf32, #tpu.memory_space<vmem>>, vector<18x18x128xf32>,
    %c0_2 = arith.constant 0 : index
    %c0_3 = arith.constant 0 : index
    %c0_4 = arith.constant 0 : index
    %c0_5 = arith.constant 0 : index
    %2 = vector.load %arg1[%c0_2, %c0_3, %c0_4, %c0_5] : memref<1x16x16x128xf32, #tpu.memory_space<vmem>>, vector<1x16x16x128xf32>
    %3 = vector.shape_cast %2 : vector<1x16x16x128xf32> to vector<16x16x128xf32>
    %c1 = arith.constant 1 : index
    %c1_6 = arith.constant 1 : index
    %c0_7 = arith.constant 0 : index
    %4 = vector.load %arg13[%c1, %c1_6, %c0_7] : memref<18x18x128xf32, #tpu.memory_space<vmem>>, vector<16x16x128xf32>
    tpu.vector_store %arg13[%c1, %c1_6, %c0_7], %3 {strides = array<i32>} : memref<18x18x128xf32, #tpu.memory_space<vmem>>, vector<16x16x128xf32>,
    %c0_8 = arith.constant 0 : index
    %c0_9 = arith.constant 0 : index
    %5 = vector.load %arg2[%c0_8, %c0_9] : memref<9x128xf32, #tpu.memory_space<vmem>>, vector<9x128xf32>
    %cst_10 = arith.constant 0.000000e+00 : f32
    %6 = vector.broadcast %cst_10 : f32 to vector<16x16x128xf32>
    %c0_11 = arith.constant 0 : index
    %c0_12 = arith.constant 0 : index
    %c0_13 = arith.constant 0 : index
    %7 = vector.load %arg13[%c0_11, %c0_12, %c0_13] : memref<18x18x128xf32, #tpu.memory_space<vmem>>, vector<16x16x128xf32>
    %8 = vector.extract_strided_slice %5 {offsets = [0, 0], sizes = [1, 128], strides = [1, 1]} : vector<9x128xf32> to vector<1x128xf32>
    %9 = vector.shape_cast %8 : vector<1x128xf32> to vector<128xf32>
    %10 = vector.shape_cast %9 : vector<128xf32> to vector<1x1x128xf32>
    %11 = vector.broadcast %10 : vector<1x1x128xf32> to vector<16x16x128xf32>
    %12 = arith.mulf %7, %11 : vector<16x16x128xf32>
    %13 = arith.addf %6, %12 : vector<16x16x128xf32>
    %c0_14 = arith.constant 0 : index
    %c1_15 = arith.constant 1 : index
    %c0_16 = arith.constant 0 : index
    %14 = vector.load %arg13[%c0_14, %c1_15, %c0_16] : memref<18x18x128xf32, #tpu.memory_space<vmem>>, vector<16x16x128xf32>
    %15 = vector.extract_strided_slice %5 {offsets = [1, 0], sizes = [1, 128], strides = [1, 1]} : vector<9x128xf32> to vector<1x128xf32>
    %16 = vector.shape_cast %15 : vector<1x128xf32> to vector<128xf32>
    %17 = vector.shape_cast %16 : vector<128xf32> to vector<1x1x128xf32>
    %18 = vector.broadcast %17 : vector<1x1x128xf32> to vector<16x16x128xf32>
    %19 = arith.mulf %14, %18 : vector<16x16x128xf32>
    %20 = arith.addf %13, %19 : vector<16x16x128xf32>
    %c0_17 = arith.constant 0 : index
    %c2 = arith.constant 2 : index
    %c0_18 = arith.constant 0 : index
    %21 = vector.load %arg13[%c0_17, %c2, %c0_18] : memref<18x18x128xf32, #tpu.memory_space<vmem>>, vector<16x16x128xf32>
    %22 = vector.extract_strided_slice %5 {offsets = [2, 0], sizes = [1, 128], strides = [1, 1]} : vector<9x128xf32> to vector<1x128xf32>
    %23 = vector.shape_cast %22 : vector<1x128xf32> to vector<128xf32>
    %24 = vector.shape_cast %23 : vector<128xf32> to vector<1x1x128xf32>
    %25 = vector.broadcast %24 : vector<1x1x128xf32> to vector<16x16x128xf32>
    %26 = arith.mulf %21, %25 : vector<16x16x128xf32>
    %27 = arith.addf %20, %26 : vector<16x16x128xf32>
    %c1_19 = arith.constant 1 : index
    %c0_20 = arith.constant 0 : index
    %c0_21 = arith.constant 0 : index
    %28 = vector.load %arg13[%c1_19, %c0_20, %c0_21] : memref<18x18x128xf32, #tpu.memory_space<vmem>>, vector<16x16x128xf32>
    %29 = vector.extract_strided_slice %5 {offsets = [3, 0], sizes = [1, 128], strides = [1, 1]} : vector<9x128xf32> to vector<1x128xf32>
    %30 = vector.shape_cast %29 : vector<1x128xf32> to vector<128xf32>
    %31 = vector.shape_cast %30 : vector<128xf32> to vector<1x1x128xf32>
    %32 = vector.broadcast %31 : vector<1x1x128xf32> to vector<16x16x128xf32>
    %33 = arith.mulf %28, %32 : vector<16x16x128xf32>
    %34 = arith.addf %27, %33 : vector<16x16x128xf32>
    %c1_22 = arith.constant 1 : index
    %c1_23 = arith.constant 1 : index
    %c0_24 = arith.constant 0 : index
    %35 = vector.load %arg13[%c1_22, %c1_23, %c0_24] : memref<18x18x128xf32, #tpu.memory_space<vmem>>, vector<16x16x128xf32>
    %36 = vector.extract_strided_slice %5 {offsets = [4, 0], sizes = [1, 128], strides = [1, 1]} : vector<9x128xf32> to vector<1x128xf32>
    %37 = vector.shape_cast %36 : vector<1x128xf32> to vector<128xf32>
    %38 = vector.shape_cast %37 : vector<128xf32> to vector<1x1x128xf32>
    %39 = vector.broadcast %38 : vector<1x1x128xf32> to vector<16x16x128xf32>
    %40 = arith.mulf %35, %39 : vector<16x16x128xf32>
    %41 = arith.addf %34, %40 : vector<16x16x128xf32>
    %c1_25 = arith.constant 1 : index
    %c2_26 = arith.constant 2 : index
    %c0_27 = arith.constant 0 : index
    %42 = vector.load %arg13[%c1_25, %c2_26, %c0_27] : memref<18x18x128xf32, #tpu.memory_space<vmem>>, vector<16x16x128xf32>
    %43 = vector.extract_strided_slice %5 {offsets = [5, 0], sizes = [1, 128], strides = [1, 1]} : vector<9x128xf32> to vector<1x128xf32>
    %44 = vector.shape_cast %43 : vector<1x128xf32> to vector<128xf32>
    %45 = vector.shape_cast %44 : vector<128xf32> to vector<1x1x128xf32>
    %46 = vector.broadcast %45 : vector<1x1x128xf32> to vector<16x16x128xf32>
    %47 = arith.mulf %42, %46 : vector<16x16x128xf32>
    %48 = arith.addf %41, %47 : vector<16x16x128xf32>
    %c2_28 = arith.constant 2 : index
    %c0_29 = arith.constant 0 : index
    %c0_30 = arith.constant 0 : index
    %49 = vector.load %arg13[%c2_28, %c0_29, %c0_30] : memref<18x18x128xf32, #tpu.memory_space<vmem>>, vector<16x16x128xf32>
    %50 = vector.extract_strided_slice %5 {offsets = [6, 0], sizes = [1, 128], strides = [1, 1]} : vector<9x128xf32> to vector<1x128xf32>
    %51 = vector.shape_cast %50 : vector<1x128xf32> to vector<128xf32>
    %52 = vector.shape_cast %51 : vector<128xf32> to vector<1x1x128xf32>
    %53 = vector.broadcast %52 : vector<1x1x128xf32> to vector<16x16x128xf32>
    %54 = arith.mulf %49, %53 : vector<16x16x128xf32>
    %55 = arith.addf %48, %54 : vector<16x16x128xf32>
    %c2_31 = arith.constant 2 : index
    %c1_32 = arith.constant 1 : index
    %c0_33 = arith.constant 0 : index
    %56 = vector.load %arg13[%c2_31, %c1_32, %c0_33] : memref<18x18x128xf32, #tpu.memory_space<vmem>>, vector<16x16x128xf32>
    %57 = vector.extract_strided_slice %5 {offsets = [7, 0], sizes = [1, 128], strides = [1, 1]} : vector<9x128xf32> to vector<1x128xf32>
    %58 = vector.shape_cast %57 : vector<1x128xf32> to vector<128xf32>
    %59 = vector.shape_cast %58 : vector<128xf32> to vector<1x1x128xf32>
    %60 = vector.broadcast %59 : vector<1x1x128xf32> to vector<16x16x128xf32>
    %61 = arith.mulf %56, %60 : vector<16x16x128xf32>
    %62 = arith.addf %55, %61 : vector<16x16x128xf32>
    %c2_34 = arith.constant 2 : index
    %c2_35 = arith.constant 2 : index
    %c0_36 = arith.constant 0 : index
    %63 = vector.load %arg13[%c2_34, %c2_35, %c0_36] : memref<18x18x128xf32, #tpu.memory_space<vmem>>, vector<16x16x128xf32>
    %64 = vector.extract_strided_slice %5 {offsets = [8, 0], sizes = [1, 128], strides = [1, 1]} : vector<9x128xf32> to vector<1x128xf32>
    %65 = vector.shape_cast %64 : vector<1x128xf32> to vector<128xf32>
    %66 = vector.shape_cast %65 : vector<128xf32> to vector<1x1x128xf32>
    %67 = vector.broadcast %66 : vector<1x1x128xf32> to vector<16x16x128xf32>
    %68 = arith.mulf %63, %67 : vector<16x16x128xf32>
    %69 = arith.addf %62, %68 : vector<16x16x128xf32>
    %c0_37 = arith.constant 0 : index
    %c0_38 = arith.constant 0 : index
    %70 = vector.load %arg3[%c0_37, %c0_38] : memref<1x128xf32, #tpu.memory_space<vmem>>, vector<1x128xf32>
    %71 = vector.shape_cast %70 : vector<1x128xf32> to vector<128xf32>
    %72 = vector.shape_cast %71 : vector<128xf32> to vector<1x1x128xf32>
    %73 = vector.broadcast %72 : vector<1x1x128xf32> to vector<16x16x128xf32>
    %74 = arith.mulf %69, %73 : vector<16x16x128xf32>
    %c0_39 = arith.constant 0 : index
    %c0_40 = arith.constant 0 : index
    %75 = vector.load %arg4[%c0_39, %c0_40] : memref<1x128xf32, #tpu.memory_space<vmem>>, vector<1x128xf32>
    %76 = vector.shape_cast %75 : vector<1x128xf32> to vector<128xf32>
    %77 = vector.shape_cast %76 : vector<128xf32> to vector<1x1x128xf32>
    %78 = vector.broadcast %77 : vector<1x1x128xf32> to vector<16x16x128xf32>
    %79 = arith.addf %74, %78 : vector<16x16x128xf32>
    %cst_41 = arith.constant 0.000000e+00 : f32
    %80 = vector.broadcast %cst_41 : f32 to vector<16x16x128xf32>
    %81 = arith.maximumf %79, %80 : vector<16x16x128xf32>
    %82 = vector.shape_cast %81 : vector<16x16x128xf32> to vector<256x128xf32>
    %83 = arith.truncf %82 : vector<256x128xf32> to vector<256x128xbf16>
    %c0_42 = arith.constant 0 : index
    %c0_43 = arith.constant 0 : index
    %84 = vector.load %arg5[%c0_42, %c0_43] : memref<128x128xbf16, #tpu.memory_space<vmem>>, vector<128x128xbf16>
    %cst_44 = arith.constant dense<0.000000e+00> : vector<256x128xf32>
    %85 = tpu.matmul %83, %84, %cst_44 {dimension_numbers = #tpu.dot_dimension_numbers<[1], [0], [0], [1], [0, 0, 1, 1], [], []>} : vector<256x128xbf16>, vector<128x128xbf16>, vector<256x128xf32> -> vector<256x128xf32>
    %c0_45 = arith.constant 0 : index
    %c0_46 = arith.constant 0 : index
    %86 = vector.load %arg6[%c0_45, %c0_46] : memref<1x128xf32, #tpu.memory_space<vmem>>, vector<1x128xf32>
    %87 = vector.shape_cast %86 : vector<1x128xf32> to vector<128xf32>
    %88 = vector.shape_cast %87 : vector<128xf32> to vector<1x128xf32>
    %89 = vector.broadcast %88 : vector<1x128xf32> to vector<256x128xf32>
    %90 = arith.mulf %85, %89 : vector<256x128xf32>
    %c0_47 = arith.constant 0 : index
    %c0_48 = arith.constant 0 : index
    %91 = vector.load %arg7[%c0_47, %c0_48] : memref<1x128xf32, #tpu.memory_space<vmem>>, vector<1x128xf32>
    %92 = vector.shape_cast %91 : vector<1x128xf32> to vector<128xf32>
    %93 = vector.shape_cast %92 : vector<128xf32> to vector<1x128xf32>
    %94 = vector.broadcast %93 : vector<1x128xf32> to vector<256x128xf32>
    %95 = arith.addf %90, %94 : vector<256x128xf32>
    %cst_49 = arith.constant 0.000000e+00 : f32
    %96 = vector.broadcast %cst_49 : f32 to vector<256x128xf32>
    %97 = arith.maximumf %95, %96 : vector<256x128xf32>
    %cst_50 = arith.constant dense<0.000000e+00> : vector<128xf32>
    %98 = vector.multi_reduction <add>, %97, %cst_50 [0] : vector<256x128xf32> to vector<128xf32>
    %99 = vector.shape_cast %98 : vector<128xf32> to vector<1x128xf32>
    %cst_51 = arith.constant 2.560000e+02 : f32
    %100 = vector.broadcast %cst_51 : f32 to vector<1x128xf32>
    %101 = arith.divf %99, %100 : vector<1x128xf32>
    %c0_52 = arith.constant 0 : index
    %c0_53 = arith.constant 0 : index
    %102 = vector.load %arg8[%c0_52, %c0_53] : memref<128x128xf32, #tpu.memory_space<vmem>>, vector<128x128xf32>
    %103 = vector.broadcast %101 : vector<1x128xf32> to vector<128x128xf32>
    %104 = arith.mulf %102, %103 : vector<128x128xf32>
    %cst_54 = arith.constant dense<0.000000e+00> : vector<128xf32>
    %105 = vector.multi_reduction <add>, %104, %cst_54 [1] : vector<128x128xf32> to vector<128xf32>
    %106 = vector.shape_cast %105 : vector<128xf32> to vector<128x1xf32>
    %c0_55 = arith.constant 0 : index
    %c0_56 = arith.constant 0 : index
    %107 = vector.load %arg9[%c0_55, %c0_56] : memref<128x1xf32, #tpu.memory_space<vmem>>, vector<128x1xf32>
    %108 = arith.addf %106, %107 : vector<128x1xf32>
    %cst_57 = arith.constant 0.000000e+00 : f32
    %109 = vector.broadcast %cst_57 : f32 to vector<128x1xf32>
    %110 = arith.maximumf %108, %109 : vector<128x1xf32>
    %c0_58 = arith.constant 0 : index
    %c0_59 = arith.constant 0 : index
    %111 = vector.load %arg10[%c0_58, %c0_59] : memref<128x128xf32, #tpu.memory_space<vmem>>, vector<128x128xf32>
    %112 = vector.broadcast %110 : vector<128x1xf32> to vector<128x128xf32>
    %113 = arith.mulf %112, %111 : vector<128x128xf32>
    %cst_60 = arith.constant dense<0.000000e+00> : vector<128xf32>
    %114 = vector.multi_reduction <add>, %113, %cst_60 [0] : vector<128x128xf32> to vector<128xf32>
    %115 = vector.shape_cast %114 : vector<128xf32> to vector<1x128xf32>
    %c0_61 = arith.constant 0 : index
    %c0_62 = arith.constant 0 : index
    %116 = vector.load %arg11[%c0_61, %c0_62] : memref<1x128xf32, #tpu.memory_space<vmem>>, vector<1x128xf32>
    %117 = arith.addf %115, %116 : vector<1x128xf32>
    %118 = arith.negf %117 : vector<1x128xf32>
    %119 = math.exp %118 : vector<1x128xf32>
    %cst_63 = arith.constant 1.000000e+00 : f32
    %120 = vector.broadcast %cst_63 : f32 to vector<1x128xf32>
    %121 = arith.addf %120, %119 : vector<1x128xf32>
    %122 = arith.divf %120, %121 : vector<1x128xf32>
    %123 = vector.broadcast %122 : vector<1x128xf32> to vector<256x128xf32>
    %124 = arith.mulf %97, %123 : vector<256x128xf32>
    %125 = vector.shape_cast %124 : vector<256x128xf32> to vector<1x16x16x128xf32>
    %c0_64 = arith.constant 0 : index
    %c0_65 = arith.constant 0 : index
    %c0_66 = arith.constant 0 : index
    %c0_67 = arith.constant 0 : index
    %126 = vector.load %arg12[%c0_64, %c0_65, %c0_66, %c0_67] : memref<1x16x16x128xf32, #tpu.memory_space<vmem>>, vector<1x16x16x128xf32>
    tpu.vector_store %arg12[%c0_64, %c0_65, %c0_66, %c0_67], %125 {strides = array<i32>} : memref<1x16x16x128xf32, #tpu.memory_space<vmem>>, vector<1x16x16x128xf32>,
    return
  }
  func.func @transform_0(%arg0: i32) -> (i32, i32, i32, i32) {
    %c0_i32 = arith.constant 0 : i32
    %c0_i32_0 = arith.constant 0 : i32
    %c0_i32_1 = arith.constant 0 : i32
    %c0_i32_2 = arith.constant 0 : i32
    return %arg0, %c0_i32, %c0_i32_0, %c0_i32_1 : i32, i32, i32, i32
  }
  func.func @transform_1(%arg0: i32) -> (i32, i32) {
    %c0_i32 = arith.constant 0 : i32
    %c0_i32_0 = arith.constant 0 : i32
    %c0_i32_1 = arith.constant 0 : i32
    return %c0_i32, %c0_i32_0 : i32, i32
  }
  func.func @transform_2(%arg0: i32) -> (i32, i32) {
    %c0_i32 = arith.constant 0 : i32
    %c0_i32_0 = arith.constant 0 : i32
    %c0_i32_1 = arith.constant 0 : i32
    return %c0_i32, %c0_i32_0 : i32, i32
  }
  func.func @transform_3(%arg0: i32) -> (i32, i32) {
    %c0_i32 = arith.constant 0 : i32
    %c0_i32_0 = arith.constant 0 : i32
    %c0_i32_1 = arith.constant 0 : i32
    return %c0_i32, %c0_i32_0 : i32, i32
  }
  func.func @transform_4(%arg0: i32) -> (i32, i32) {
    %c0_i32 = arith.constant 0 : i32
    %c0_i32_0 = arith.constant 0 : i32
    %c0_i32_1 = arith.constant 0 : i32
    return %c0_i32, %c0_i32_0 : i32, i32
  }
  func.func @transform_5(%arg0: i32) -> (i32, i32) {
    %c0_i32 = arith.constant 0 : i32
    %c0_i32_0 = arith.constant 0 : i32
    %c0_i32_1 = arith.constant 0 : i32
    return %c0_i32, %c0_i32_0 : i32, i32
  }
  func.func @transform_6(%arg0: i32) -> (i32, i32) {
    %c0_i32 = arith.constant 0 : i32
    %c0_i32_0 = arith.constant 0 : i32
    %c0_i32_1 = arith.constant 0 : i32
    return %c0_i32, %c0_i32_0 : i32, i32
  }
  func.func @transform_7(%arg0: i32) -> (i32, i32) {
    %c0_i32 = arith.constant 0 : i32
    %c0_i32_0 = arith.constant 0 : i32
    %c0_i32_1 = arith.constant 0 : i32
    return %c0_i32, %c0_i32_0 : i32, i32
  }
  func.func @transform_8(%arg0: i32) -> (i32, i32) {
    %c0_i32 = arith.constant 0 : i32
    %c0_i32_0 = arith.constant 0 : i32
    %c0_i32_1 = arith.constant 0 : i32
    return %c0_i32, %c0_i32_0 : i32, i32
  }
  func.func @transform_9(%arg0: i32) -> (i32, i32) {
    %c0_i32 = arith.constant 0 : i32
    %c0_i32_0 = arith.constant 0 : i32
    %c0_i32_1 = arith.constant 0 : i32
    return %c0_i32, %c0_i32_0 : i32, i32
  }
  func.func @transform_10(%arg0: i32) -> (i32, i32) {
    %c0_i32 = arith.constant 0 : i32
    %c0_i32_0 = arith.constant 0 : i32
    %c0_i32_1 = arith.constant 0 : i32
    return %c0_i32, %c0_i32_0 : i32, i32
  }
  func.func @transform_11(%arg0: i32) -> (i32, i32, i32, i32) {
    %c0_i32 = arith.constant 0 : i32
    %c0_i32_0 = arith.constant 0 : i32
    %c0_i32_1 = arith.constant 0 : i32
    %c0_i32_2 = arith.constant 0 : i32
    return %arg0, %c0_i32, %c0_i32_0, %c0_i32_1 : i32, i32, i32, i32
  }
}

</mosaic_0001>

<bundles_post_ra>
// kernel: tpu_custom_call.1
= control target key start
LH: loop header
LB: loop body
LE: loop exit
PB: predicated region body
PF: predicated region fallthrough
CT: control target
= control target key end

     0   :  { %s4353_s0 = inlined_call_operand.hbm [shape: f32[2,16,16,128], index: 0, kind: input, shape index: {}]   ;;  %s4354_s1 = inlined_call_operand.vmem [shape: f32[9,128], index: 1, kind: input, shape index: {}]   ;;  %s4355_s2 = inlined_call_operand.vmem [shape: f32[1,128], index: 2, kind: input, shape index: {}]   ;;  %s4356_s3 = inlined_call_operand.vmem [shape: f32[1,128], index: 3, kind: input, shape index: {}]   ;;  %s4357_s4 = inlined_call_operand.hbm [shape: bf16[128,128], index: 4, kind: input, shape index: {}]   ;;  %s4358_s5 = inlined_call_operand.vmem [shape: f32[1,128], index: 5, kind: input, shape index: {}]   ;;  %s4359_s6 = inlined_call_operand.vmem [shape: f32[1,128], index: 6, kind: input, shape index: {}]   ;;  %s4360_s7 = inlined_call_operand.vmem [shape: f32[128,128], index: 7, kind: input, shape index: {}]   ;;  %s4361_s8 = inlined_call_operand.vmem [shape: f32[128,1], index: 8, kind: input, shape index: {}]   ;;  %s4362_s9 = inlined_call_operand.hbm [shape: f32[128,128], index: 9, kind: input, shape index: {}]   ;;  %s4363_s10 = inlined_call_operand.vmem [shape: f32[1,128], index: 10, kind: input, shape index: {}]   ;;  %s4364_s11 = inlined_call_operand.hbm [shape: f32[2,16,16,128], index: 11, kind: output, shape index: {}]  }
   0x1   :  { %4409 = sst [smem:[#allocation19_spill]] %s4364_s11 }
   0x2   :  { %16 = vsyncpa [#allocation4], 0 }
   0x3   :  { %18 = vsyncpa [#allocation4 + $0x1], 0 }
   0x4   :  { %19 = vsyncpa [#allocation7], 0 }
   0x5   :  { %20 = vsyncpa [#allocation5], 0 }
   0x6   :  { %22 = vsyncpa [#allocation5 + $0x1], 0  ;;  %s2835_s17 = smov 0   ;;  %s2837_s18 = smov 0  }
   0x7   :  { %s2839_s19 = smov 0   ;;  %s2841_s20 = smov 0  }
   0x8 LB: > { %4410 = sst [smem:[#allocation13_spill]] %s2749_s17  ;;  %s2856_s21 = sadd.s32 4294967295, %s2761_s20   ;;  %s2761_s20 = sphi %s2841_s20, %s4470_s20   ;;  %s2757_s19 = sphi %s2839_s19, %s4469_s19   ;;  %s2753_s18 = sphi %s2837_s18, %s4468_s18   ;;  %s2749_s17 = sphi %s2835_s17, %s4467_s17  }
   0x9   : > { %s2384_s22 = sadd.s32 4294967294, %s2761_s20   ;;  %p48_p0 = scmp.ne.s32.totalorder %s2753_s18, %s2749_s17 }
   0xa   : > { %p4365_p1 = scmp.eq.s32.totalorder %s2856_s21, 0  ;;  %p288_p3 = scmp.eq.s32.totalorder %s2384_s22, 1 }
   0xb   : > { %p2385_p5 = scmp.ge.s32.totalorder %s2761_s20, 1  ;;  %p295_p7 = scmp.lt.s32.totalorder %s2761_s20, 3 }
   0xc   : > { %p2865_p4 = por %p4365_p1, %p48_p0  ;;  %p2870_p6 = por %p288_p3, %p48_p0 }
   0xd   : > { %p2875_p8 = pnand %p2385_p5, %p295_p7  ;;  %s2763_s26 = smov [#allocation6]  }
   0xe   : > { %s4411_s23 = scalar_select %p2865_p4, 1, 0 }
   0xf   : > { %s4412_s24 = scalar_select %p2870_p6, 1, 0 }
  0x10   : > { %s316_s27 = sshll.u32 %s2763_s26, 4  ;;  %p2518_p9 = pneg %p2875_p8  ;;  %s2879_s27 = int_to_ptr.vmem [resolvable:$true] %s316_s27 }
  0x11   : > { %4413 = sst [smem:[#allocation14_spill]] %s4412_s24  ;;  %s2764_s29 = smov [#allocation8]  }
  0x12   : > { %p2886_p11 = pnand %p2518_p9, %p4365_p1  ;;  %s341_s30 = sshll.u32 %s2764_s29, 4  ;;  %s2890_s30 = int_to_ptr.vmem [resolvable:$true] %s341_s30 }
  0x13   : > { %s2605_s14 = scalar_lea.hbm %s4357_s4, 1024 }
  0x14   : > { %p2606_p12 = scmp.ne.s32.totalorder %s4357_s4, %s2605_s14  ;;  %p2607_p13 = pneg %p2886_p11 }
  0x15   : > { %p2612_p5 = scmp.lt.u32.totalorder %s2605_s14, %s4357_s4 }
  0x16   : > { %p2608_p0 = pnand %p2607_p13, %p2606_p12 }
  0x18   : > { %p2609_p3 = pneg %p2608_p0 }
  0x1a   : > { %p2614_p7 = pnand %p2612_p5, %p2609_p3 }
  0x1c   : > { %2617 = shalt.err (!%p2614_p7)
}
  0x1d   : > { %s2618_s29 = scalar_lea.vmem %s2879_s27, 1024  ;;  %p2626_p2 = scmp.lt.s32.totalorder %s2879_s27, %s2879_s27 }
  0x1e   : > { %p2619_p9 = scmp.ne.s32.totalorder %s2879_s27, %s2618_s29  ;;  %p2627_p12 = scmp.lt.s32.totalorder %s2618_s29, %s2618_s29 }
  0x20   : > { %p2621_p10 = pnand %p2619_p9, %p2607_p13  ;;  %p2628_p0 = por %p2627_p12, %p2626_p2 }
  0x22   : > { %p2622_p1 = pneg %p2621_p10 }
  0x24   : > { %p2629_p6 = pnand %p2628_p0, %p2622_p1 }
  0x26   : > { %2632 = shalt.err (!%p2629_p6)
}
  0x27   : > { %s2765_s12 = smov 64   ;;  %s2766_s13 = smov 4  }
  0x28   : > { %2521 = dma.hbm_to_vmem [thread:$0]  (!%p2886_p11), %s4357_s4, 1024, %s2879_s27, [#allocation7], %s2765_s12, %s2765_s12, %s2766_s13  }
  0x29   : > { %s2633_s26 = scalar_lea.hbm %s4362_s9, 2048 }
  0x2a   : > { %p2634_p2 = scmp.ne.s32.totalorder %s4362_s9, %s2633_s26  ;;  %p2640_p10 = scmp.lt.u32.totalorder %s2633_s26, %s4362_s9 }
  0x2c   : > { %p2636_p1 = pnand %p2634_p2, %p2607_p13 }
  0x2e   : > { %p2637_p6 = pneg %p2636_p1 }
  0x30   : > { %p2642_p3 = pnand %p2640_p10, %p2637_p6 }
  0x32   : > { %2645 = shalt.err (!%p2642_p3)
}
  0x33   : > { %s2646_s27 = scalar_lea.vmem %s2890_s30, 2048  ;;  %p2654_p12 = scmp.lt.s32.totalorder %s2890_s30, %s2890_s30 }
  0x34   : > { %p2647_p5 = scmp.ne.s32.totalorder %s2890_s30, %s2646_s27  ;;  %p2655_p0 = scmp.lt.s32.totalorder %s2646_s27, %s2646_s27 }
  0x36   : > { %p2649_p7 = pnand %p2647_p5, %p2607_p13  ;;  %p2656_p2 = por %p2655_p0, %p2654_p12 }
  0x38   : > { %p2650_p9 = pneg %p2649_p7 }
  0x3a   : > { %p2657_p1 = pnand %p2656_p2, %p2650_p9 }
  0x3c   : > { %2660 = shalt.err (!%p2657_p1)
}
  0x3d   : > { %s4369_s11 = smov 128   ;;  %s4370_s17 = smov 8  }
  0x3e   : > { %2524 = dma.hbm_to_vmem [thread:$0]  (!%p2886_p11), %s4362_s9, 2048, %s2890_s30, [#allocation7], %s4369_s11, %s4369_s11, %s4370_s17  }
  0x3f   : > { %s2948_s13 = sadd.s32 1, %s2761_s20   ;;  %s35_s15 = sadd.s32 1, %s2757_s19 }
  0x40   : > { %s32_s14 = ssub.s32 %s2761_s20, %s2948_s13  ;;  %p42_p6 = scmp.ne.s32.totalorder %s2757_s19, %s2753_s18 }
  0x41   : > { %p33_p13 = scmp.eq.s32.totalorder %s32_s14, 0  ;;  %p43_p10 = scmp.eq.s32.totalorder %s2761_s20, 0 }
  0x42   : > { %p4416_p5 = scmp.eq.s32.totalorder %s2856_s21, 1  ;;  %p2535_p9 = scmp.lt.s32.totalorder %s2761_s20, 2 }
  0x43   : > { %s2957_s16 = scalar_select %p33_p13, %s2757_s19, %s35_s15  }
  0x44   : > { %p44_p3 = por %p43_p10, %p42_p6  ;;  %p2961_p7 = por %p4416_p5, %p42_p6 }
  0x45   : > { %s358_s22 = sand.u32 1, %s2757_s19   ;;  %s2416_s30 = sshll.u32 %s2761_s20, 12 }
  0x46   : > { %s4417_s28 = scalar_select %p2961_p7, 1, 0 }
  0x47   : > { %s2389_s26 = sshll.u32 %s358_s22, 8  ;;  %s2971_s24 = scalar_lea.hbm %s4353_s0, %s2416_s30 }
  0x48   : > { %s362_s12 = scalar_lea.vmem [#allocation3], %s2389_s26  ;;  %p2975_p11 = pnand %p2535_p9, %p44_p3 }
  0x49   : > { %s369_s14 = sshll.u32 %s362_s12, 4  ;;  %s2979_s11 = scalar_lea.sflag [#allocation4], %s358_s22  ;;  %s2973_s14 = int_to_ptr.vmem [resolvable:$true] %s369_s14 }
  0x4a   : > { %s2661_s17 = scalar_lea.hbm %s2971_s24, 4096  ;;  %p2663_p0 = pneg %p2975_p11 }
  0x4b   : > { %p2662_p12 = scmp.ne.s32.totalorder %s2971_s24, %s2661_s17  ;;  %s2666_s29 = scalar_lea.hbm %s4353_s0, 8192 }
  0x4c   : > { %p2667_p13 = scmp.lt.u32.totalorder %s2971_s24, %s4353_s0  ;;  %p2668_p6 = scmp.lt.u32.totalorder %s2666_s29, %s2661_s17 }
  0x4d   : > { %p2664_p2 = pnand %p2663_p0, %p2662_p12  ;;  %p2670_p3 = scmp.lt.u32.totalorder %s2661_s17, %s2971_s24 }
  0x4e   : > { %p2669_p10 = por %p2668_p6, %p2667_p13 }
  0x4f   : > { %p2665_p1 = pneg %p2664_p2 }
  0x50   : > { %p2671_p5 = por %p2670_p3, %p2669_p10 }
  0x52   : > { %p2672_p9 = pnand %p2671_p5, %p2665_p1 }
  0x54   : > { %2675 = shalt.err (!%p2672_p9)
}
  0x55   : > { %s2676_s22 = scalar_lea.vmem %s2973_s14, 4096  ;;  %s2769_s26 = smov [#allocation3]  }
  0x56   : > { %p2677_p12 = scmp.ne.s32.totalorder %s2973_s14, %s2676_s22  ;;  %s2681_s30 = sshll.u32 %s2769_s26, 4  ;;  %s2682_s30 = int_to_ptr.vmem [resolvable:$false] %s2681_s30 }
  0x57   : > { %s2683_s27 = scalar_lea.vmem %s2682_s30, 8192  ;;  %p2684_p4 = scmp.lt.s32.totalorder %s2973_s14, %s2682_s30 }
  0x58   : > { %p2679_p2 = pnand %p2677_p12, %p2663_p0  ;;  %p2685_p13 = scmp.lt.s32.totalorder %s2683_s27, %s2676_s22 }
  0x5a   : > { %p2680_p7 = pneg %p2679_p2  ;;  %p2686_p6 = por %p2685_p13, %p2684_p4 }
  0x5c   : > { %p2687_p10 = pnand %p2686_p6, %p2680_p7 }
  0x5e   : > { %2690 = shalt.err (!%p2687_p10)
}
  0x5f   : > { %s4419_s17 = smov 8   ;;  %s4420_s29 = smov 128  }
  0x60   : > { %2528 = dma.hbm_to_vmem [thread:$0]  (!%p2975_p11), %s2971_s24, 4096, %s2973_s14, %s2979_s11, %s4420_s29, %s4420_s29, %s4419_s17  }
  0x61   : > { %381 = sbr.rel (%p2875_p8) target bundleno = 961 (0x3c1), region = 64 }
  0x68   : > { %s3013_s12 = sand.u32 1, %s2753_s18   ;;  %p4421_p4 = scmp.ne.s32.totalorder %s4411_s23, 0 }
  0x69   : > { %s2393_s22 = sshll.u32 %s3013_s12, 8  ;;  %s384_s26 = scalar_lea.sflag [#allocation4], %s3013_s12 }
  0x6a   : > { %s3019_s15 = scalar_lea.vmem [#allocation3], %s2393_s22 }
  0x6b   : > { %2736 = dma.done.wait (%p4421_p4), %s384_s26, 4096  }
  0x6c   : > { %2738 = vsyncadd (%p4421_p4), %s384_s26, 4294963200  ;;  %p4422_p7 = scmp.eq.s32.totalorder %s2856_s21, 0 }
  0x6e   : > { %2740 = dma.done.wait (%p4422_p7), [#allocation7], 3072   ;;  %p4423_p8 = pmov %p4422_p7 }
  0x6f   : > { %v2770_v0 = vmov 0.0   ;;  %v588_v1 = vlaneseq  ;;  %v2583_v3 = vld [vmem:[#allocation6] sm:$0xff]   ;;  %v2584_v4 = vld [vmem:[#allocation6 + $0x8] sm:$0xff]   ;;  %v2585_v7 = vld [vmem:[#allocation6 + $0x10] sm:$0xff]   ;;  %s4228_s17 = scalar_lea.vmem [#allocation9], %s2393_s22  ;;  %s2417_s22 = sshll.u32 %s2856_s21, 12 }
  0x70   : > { %2742 = vsyncadd (%p4423_p8), [#allocation7], 4294964224  ;;  %435 = vst [vmem:[#allocation2] sm:$0xff] %v2770_v0  ;;  %2442 = vmatprep.subr.bf16.mxu0 %v2583_v3  ;;  %2490 = vmatprep.subr.bf16.mxu1 %v2583_v3  ;;  %v3038_v13 = vld [vmem:[#allocation6 + $0x18] sm:$0xff]   ;;  %v489_v15 = vld [vmem:[%s3019_s15] sm:$0xff]  ;;  %s2292_s29 = sshll.u32 %s4228_s17, 4  ;;  %s4289_s29 = int_to_ptr.vmem [resolvable:$true] %s2292_s29 }
  0x71   : > { %436 = vst [vmem:[#allocation2 + $0x8] sm:$0xff] %v2770_v0  ;;  %437 = vst [vmem:[#allocation2 + $0x10] sm:$0x3] %v2770_v0  ;;  %v3029_v2 = vshrl.u32 %v588_v1, 7  ;;  %2443 = vmatpush3.bf16.msra.mxu0 %v2583_v3  ;;  %2498 = vmatpush3.bf16.msra.mxu1 %v2583_v3  ;;  %v490_v16 = vld [vmem:[%s3019_s15 + $0x8] sm:$0xff]  ;;  %v3044_v17 = vld [vmem:[%s3019_s15 + $0x10] sm:$0xff] }
  0x72   : > { %438 = vst [vmem:[#allocation2 + $0x18] sm:$0xff] %v2770_v0  ;;  %439 = vst [vmem:[#allocation2 + $0x20] sm:$0xff] %v2770_v0  ;;  %2444 = vmatprep.subr.bf16.mxu0 %v2584_v4  ;;  %2491 = vmatprep.subr.bf16.mxu1 %v2584_v4  ;;  %v3047_v18 = vld [vmem:[%s3019_s15 + $0x18] sm:$0xff]  ;;  %v554_v19 = vld [vmem:[%s4354_s1] sm:$0xff]  ;;  %s2279_s25 = scalar_lea.sflag [#allocation5], %s3013_s12  ;;  %s2691_s11 = scalar_lea.vmem %s4289_s29, 4096 }
  0x73   : > { %440 = vst [vmem:[#allocation2 + $0x28] sm:$0x3] %v2770_v0  ;;  %441 = vst [vmem:[#allocation2 + $0x30] sm:$0xff] %v2770_v0  ;;  %v4373_v5 = vsub.s32 0, %v3029_v2  ;;  %v690_v6 = vsub.s32 1, %v3029_v2  ;;  %v790_v8 = vsub.s32 2, %v3029_v2  ;;  %p2692_p11 = scmp.ne.s32.totalorder %s4289_s29, %s2691_s11 }
  0x74   : > { %442 = vst [vmem:[#allocation2 + $0x38] sm:$0xff] %v2770_v0  ;;  %443 = vst [vmem:[#allocation2 + $0x40] sm:$0x3] %v2770_v0  ;;  %v890_v9 = vsub.s32 3, %v3029_v2  ;;  %v990_v10 = vsub.s32 4, %v3029_v2  ;;  %v1090_v11 = vsub.s32 5, %v3029_v2 }
  0x75   : > { %444 = vst [vmem:[#allocation2 + $0x48] sm:$0xff] %v2770_v0  ;;  %445 = vst [vmem:[#allocation2 + $0x50] sm:$0xff] %v2770_v0  ;;  %v1191_v12 = vsub.s32 6, %v3029_v2  ;;  %2445 = vmatpush3.bf16.msra.mxu0 %v2584_v4  ;;  %v1291_v14 = vsub.s32 7, %v3029_v2  ;;  %2499 = vmatpush3.bf16.msra.mxu1 %v2584_v4  ;;  %v3056_v20 = vrot.slane %v554_v19, %v4373_v5  ;;  %v3064_v27 = vld [vmem:[#allocation6 + $0x20] sm:$0xff]   ;;  %v3083_v38 = vld [vmem:[%s3019_s15 + $0x28] sm:$0xff] }
  0x76   : > { %446 = vst [vmem:[#allocation2 + $0x58] sm:$0x3] %v2770_v0  ;;  %447 = vst [vmem:[#allocation2 + $0x60] sm:$0xff] %v2770_v0  ;;  %2446 = vmatprep.subr.bf16.mxu0 %v2585_v7  ;;  %2492 = vmatprep.subr.bf16.mxu1 %v2585_v7  ;;  %v3058_v23 = vrot.slane %v554_v19, %v690_v6  ;;  %v3060_v25 = vrot.slane %v554_v19, %v790_v8  ;;  %v3080_v37 = vld [vmem:[%s3019_s15 + $0x20] sm:$0xff]  ;;  %v3086_v39 = vld [vmem:[%s3019_s15 + $0x30] sm:$0xff]  ;;  %p4462_p0 = scmp.ne.s32.totalorder %s4417_s28, 0 }
  0x77   : > { %448 = vst [vmem:[#allocation2 + $0x68] sm:$0xff] %v2770_v0  ;;  %449 = vst [vmem:[#allocation2 + $0x70] sm:$0x3] %v2770_v0  ;;  %v3062_v26 = vrot.slane %v554_v19, %v890_v9  ;;  %v3066_v29 = vrot.slane %v554_v19, %v990_v10  ;;  %v3068_v30 = vrot.slane %v554_v19, %v1090_v11  ;;  %v592_v33 = vmul.f32 0.0, %v3056_v20  ;;  %v3102_v44 = vld [vmem:[%s3019_s15 + $0x38] sm:$0xff]  ;;  %v3106_v45 = vld [vmem:[%s3019_s15 + $0x40] sm:$0xff] }
  0x78   : > { %450 = vst [vmem:[#allocation2 + $0x78] sm:$0xff] %v2770_v0  ;;  %451 = vst [vmem:[#allocation2 + $0x80] sm:$0xff] %v2770_v0  ;;  %v656_v21 = vld [vmem:[#allocation2 + $0x1] sm:$0xff]  ;;  %v657_v22 = vld [vmem:[#allocation2 + $0x9] sm:$0xff]  ;;  %v3070_v31 = vrot.slane %v554_v19, %v1191_v12  ;;  %v3072_v32 = vrot.slane %v554_v19, %v1291_v14  ;;  %v694_v52 = vmul.f32 %v3058_v23, %v489_v15  ;;  %p2693_p1 = pnand %p2692_p11, %p4462_p0  ;;  %s2772_s24 = smov [#allocation9]  }
  0x79   : > { %452 = vst [vmem:[#allocation2 + $0x88] sm:$0x3] %v2770_v0  ;;  %453 = vst [vmem:[#allocation2 + $0x90] sm:$0xff] %v2770_v0  ;;  %v756_v24 = vld [vmem:[#allocation2 + $0x2] sm:$0xff]  ;;  %2447 = vmatpush3.bf16.msra.mxu0 %v2585_v7  ;;  %v757_v28 = vld [vmem:[#allocation2 + $0xa] sm:$0xff]  ;;  %v692_v34 = vmul.f32 %v3058_v23, %v656_v21  ;;  %v693_v35 = vmul.f32 %v3058_v23, %v657_v22  ;;  %v3090_v41 = vmul.f32 %v3066_v29, %v489_v15  ;;  %s2695_s14 = sshll.u32 %s2772_s24, 4  ;;  %s2696_s14 = int_to_ptr.vmem [resolvable:$false] %s2695_s14 }
  0x7a   : > { %454 = vst [vmem:[#allocation2 + $0x98] sm:$0xff] %v2770_v0  ;;  %455 = vst [vmem:[#allocation2 + $0xa0] sm:$0x3] %v2770_v0  ;;  %2448 = vmatprep.subr.bf16.mxu0 %v3038_v13  ;;  %v792_v36 = vmul.f32 %v3060_v25, %v756_v24  ;;  %v793_v40 = vmul.f32 %v3060_v25, %v757_v28  ;;  %v3093_v42 = vmul.f32 %v3066_v29, %v490_v16  ;;  %v3109_v46 = vld [vmem:[%s3019_s15 + $0x48] sm:$0xff]  ;;  %v3116_v48 = vld [vmem:[%s4354_s1 + $0x8] ss:$0 sm:$0xff]  ;;  %p2694_p3 = pneg %p2693_p1  ;;  %p2698_p5 = scmp.lt.s32.totalorder %s4289_s29, %s2696_s14 }
  0x7b   : > { %456 = vst [vmem:[#allocation2 + $0xa8] sm:$0xff] %v2770_v0  ;;  %457 = vst [vmem:[#allocation2 + $0xb0] sm:$0xff] %v2770_v0  ;;  %v3097_v43 = vmul.f32 %v3072_v32, %v3044_v17  ;;  %2500 = vmatpush3.bf16.msra.mxu1 %v2585_v7  ;;  %v3111_v47 = vld [vmem:[#allocation6 + $0x28] sm:$0xff]   ;;  %v724_v49 = vadd.f32 %v692_v34, %v592_v33  ;;  %v725_v50 = vadd.f32 %v693_v35, %v592_v33  ;;  %v3128_v53 = vld [vmem:[%s3019_s15 + $0x50] sm:$0xff]  ;;  %s2697_s30 = scalar_lea.vmem %s2696_s14, 8192 }
  0x7c   : > { %458 = vst [vmem:[#allocation2 + $0xb8] sm:$0x3] %v2770_v0  ;;  %459 = vst [vmem:[#allocation2 + $0xc0] sm:$0xff] %v2770_v0  ;;  %v3120_v51 = vmul.f32 %v3072_v32, %v3047_v18  ;;  %2493 = vmatprep.subr.bf16.mxu1 %v3038_v13  ;;  %v3131_v54 = vld [vmem:[%s3019_s15 + $0x58] sm:$0xff]  ;;  %v3134_v55 = vld [vmem:[%s3019_s15 + $0x60] sm:$0xff]  ;;  %v695_v56 = vmul.f32 %v3058_v23, %v490_v16  ;;  %v3140_v57 = vmul.f32 %v3066_v29, %v3044_v17  ;;  %p2699_p9 = scmp.lt.s32.totalorder %s2697_s30, %s2691_s11 }
  0x7d   : > { %460 = vst [vmem:[#allocation2 + $0xc8] sm:$0xff] %v2770_v0  ;;  %461 = vst [vmem:[#allocation2 + $0xd0] sm:$0x3] %v2770_v0  ;;  %2449 = vmatpush3.bf16.msra.mxu0 %v3038_v13  ;;  %v3144_v58 = vmul.f32 %v3066_v29, %v3047_v18  ;;  %v3148_v59 = vmul.f32 %v3072_v32, %v3080_v37  ;;  %v3153_v60 = vld [vmem:[%s3019_s15 + $0x68] sm:$0xff]  ;;  %v3157_v61 = vld [vmem:[%s3019_s15 + $0x70] sm:$0xff]  ;;  %v824_v63 = vadd.f32 %v792_v36, %v724_v49 }
  0x7e   : > { %462 = vst [vmem:[#allocation2 + $0xd8] sm:$0xff] %v2770_v0  ;;  %463 = vst [vmem:[#allocation2 + $0xe0] sm:$0xff] %v2770_v0  ;;  %v3160_v62 = vld [vmem:[%s3019_s15 + $0x78] sm:$0xff]  ;;  %2450 = vmatprep.subr.bf16.mxu0 %v3064_v27  ;;  %v3165_v6 = vmul.f32 %v3072_v32, %v3083_v38  ;;  %v3169_v7 = vmul.f32 %v3058_v23, %v3044_v17  ;;  %v3185_v28 = vld [vmem:[%s3019_s15 + $0x80] sm:$0xff]  ;;  %p2700_p12 = por %p2699_p9, %p2698_p5 }
  0x7f   : > { %464 = vst [vmem:[#allocation2 + $0xe8] sm:$0x3] %v2770_v0  ;;  %465 = vst [vmem:[#allocation2 + $0xf0] sm:$0xff] %v2770_v0  ;;  %2501 = vmatpush3.bf16.msra.mxu1 %v3038_v13  ;;  %v3191_v36 = vld [vmem:[%s3019_s15 + $0x88] sm:$0xff]  ;;  %v3198_v49 = vld [vmem:[%s3019_s15 + $0x98] sm:$0xff] }
  0x80   : > { %466 = vst [vmem:[#allocation2 + $0xf8] sm:$0xff] %v2770_v0  ;;  %467 = vst [vmem:[#allocation2 + $0x100] sm:$0x3] %v2770_v0  ;;  %2494 = vmatprep.subr.bf16.mxu1 %v3064_v27  ;;  %p2701_p2 = pnand %p2700_p12, %p2694_p3 }
  0x81   : > { %468 = vst [vmem:[#allocation2 + $0x108] sm:$0xff] %v2770_v0  ;;  %469 = vst [vmem:[#allocation2 + $0x110] sm:$0xff] %v2770_v0  ;;  %2451 = vmatpush3.bf16.msra.mxu0 %v3064_v27 }
  0x82   : > { %470 = vst [vmem:[#allocation2 + $0x118] sm:$0x3] %v2770_v0  ;;  %471 = vst [vmem:[#allocation2 + $0x120] sm:$0xff] %v2770_v0  ;;  %2452 = vmatprep.subr.bf16.mxu0 %v3111_v47 }
  0x83   : > { %472 = vst [vmem:[#allocation2 + $0x128] sm:$0xff] %v2770_v0  ;;  %473 = vst [vmem:[#allocation2 + $0x130] sm:$0x3] %v2770_v0  ;;  %2502 = vmatpush3.bf16.msra.mxu1 %v3064_v27 }
  0x84   : > { %474 = vst [vmem:[#allocation2 + $0x138] sm:$0xff] %v2770_v0  ;;  %475 = vst [vmem:[#allocation2 + $0x140] sm:$0xff] %v2770_v0  ;;  %2495 = vmatprep.subr.bf16.mxu1 %v3111_v47 }
  0x85   : > { %476 = vst [vmem:[#allocation2 + $0x148] sm:$0x3] %v2770_v0  ;;  %477 = vst [vmem:[#allocation2 + $0x150] sm:$0xff] %v2770_v0  ;;  %2453 = vmatpush3.bf16.msra.mxu0 %v3111_v47 }
  0x86   : > { %478 = vst [vmem:[#allocation2 + $0x158] sm:$0xff] %v2770_v0  ;;  %479 = vst [vmem:[#allocation2 + $0x160] sm:$0x3] %v2770_v0 }
  0x87   : > { %480 = vst [vmem:[#allocation2 + $0x168] sm:$0xff] %v2770_v0  ;;  %481 = vst [vmem:[#allocation2 + $0x170] sm:$0xff] %v2770_v0  ;;  %2503 = vmatpush3.bf16.msra.mxu1 %v3111_v47  ;;  %v3250_v47 = vld [vmem:[%s4355_s2] ss:$0 sm:$0xff] }
  0x88   : > { %482 = vst [vmem:[#allocation2 + $0x178] sm:$0x3] %v2770_v0  ;;  %483 = vst [vmem:[#allocation2 + $0x180] sm:$0xff] %v2770_v0 }
  0x89   : > { %484 = vst [vmem:[#allocation2 + $0x188] sm:$0xff] %v2770_v0  ;;  %485 = vst [vmem:[#allocation2 + $0x190] sm:$0x3] %v2770_v0 }
  0x8a   : > { %486 = vst [vmem:[#allocation2 + $0x198] sm:$0xff] %v2770_v0  ;;  %487 = vst [vmem:[#allocation2 + $0x1a0] sm:$0xff] %v2770_v0 }
  0x8b   : > { %488 = vst [vmem:[#allocation2 + $0x1a8] sm:$0x3] %v2770_v0  ;;  %4424 = vst [vmem:[#allocation15_spill] sm:$0xff] %v3029_v2  ;;  %v825_v0 = vadd.f32 %v793_v40, %v725_v50  ;;  %v3195_v40 = vld [vmem:[%s3019_s15 + $0x90] sm:$0xff] }
  0x8c   : > { %522 = vst [vmem:[#allocation2 + $0x19] sm:$0xff] %v489_v15  ;;  %523 = vst [vmem:[#allocation2 + $0x21] sm:$0xff] %v490_v16  ;;  %v2589_v50 = vld [vmem:[#allocation6 + $0x30] sm:$0xff]  }
  0x8d   : > { %524 = vst [vmem:[#allocation2 + $0x31] sm:$0xff] %v3044_v17  ;;  %525 = vst [vmem:[#allocation2 + $0x39] sm:$0xff] %v3047_v18  ;;  %2454 = vmatprep.subr.bf16.mxu0 %v2589_v50  ;;  %2496 = vmatprep.subr.bf16.mxu1 %v2589_v50 }
  0x8e   : > { %526 = vst [vmem:[#allocation2 + $0x49] sm:$0xff] %v3080_v37  ;;  %527 = vst [vmem:[#allocation2 + $0x51] sm:$0xff] %v3083_v38  ;;  %2455 = vmatpush3.bf16.msra.mxu0 %v2589_v50  ;;  %2504 = vmatpush3.bf16.msra.mxu1 %v2589_v50 }
  0x8f   : > { %528 = vst [vmem:[#allocation2 + $0x61] sm:$0xff] %v3086_v39  ;;  %529 = vst [vmem:[#allocation2 + $0x69] sm:$0xff] %v3102_v44 }
  0x90   : > { %530 = vst [vmem:[#allocation2 + $0x79] sm:$0xff] %v3106_v45  ;;  %531 = vst [vmem:[#allocation2 + $0x81] sm:$0xff] %v3109_v46 }
  0x91   : > { %532 = vst [vmem:[#allocation2 + $0x91] sm:$0xff] %v3128_v53  ;;  %533 = vst [vmem:[#allocation2 + $0x99] sm:$0xff] %v3131_v54 }
  0x92   : > { %534 = vst [vmem:[#allocation2 + $0xa9] sm:$0xff] %v3134_v55  ;;  %535 = vst [vmem:[#allocation2 + $0xb1] sm:$0xff] %v3153_v60 }
  0x93   : > { %v856_v1 = vld [vmem:[#allocation2 + $0x18] sm:$0xff]  ;;  %v857_v3 = vld [vmem:[#allocation2 + $0x20] sm:$0xff]  ;;  %536 = vst [vmem:[#allocation2 + $0xc1] sm:$0xff] %v3157_v61  ;;  %537 = vst [vmem:[#allocation2 + $0xc9] sm:$0xff] %v3160_v62 }
  0x94   : > { %v1056_v4 = vld [vmem:[#allocation2 + $0x1a] sm:$0xff]  ;;  %v892_v8 = vmul.f32 %v3062_v26, %v856_v1  ;;  %v893_v9 = vmul.f32 %v3062_v26, %v857_v3  ;;  %v1057_v10 = vld [vmem:[#allocation2 + $0x22] sm:$0xff]  ;;  %v1157_v12 = vld [vmem:[#allocation2 + $0x30] sm:$0xff]  ;;  %v594_v15 = vmul.f32 %v856_v1, %v3056_v20  ;;  %v595_v24 = vmul.f32 %v857_v3, %v3056_v20  ;;  %4425 = vst [vmem:[#allocation16_spill] sm:$0xff] %v3191_v36 }
  0x95   : > { %v1092_v11 = vmul.f32 %v3068_v30, %v1056_v4  ;;  %v1158_v14 = vld [vmem:[#allocation2 + $0x38] sm:$0xff]  ;;  %v1093_v16 = vmul.f32 %v3068_v30, %v1057_v10  ;;  %v1193_v17 = vmul.f32 %v3070_v31, %v1157_v12  ;;  %538 = vst [vmem:[#allocation2 + $0xd9] sm:$0xff] %v3185_v28  ;;  %4426 = vst [vmem:[#allocation17_spill] sm:$0xff] %v3195_v40 }
  0x96   : > { %v1194_v19 = vmul.f32 %v3070_v31, %v1158_v14  ;;  %v1357_v21 = vld [vmem:[#allocation2 + $0x32] sm:$0xff]  ;;  %v1358_v22 = vld [vmem:[#allocation2 + $0x3a] sm:$0xff]  ;;  %v924_v33 = vadd.f32 %v892_v8, %v824_v63  ;;  %v925_v13 = vadd.f32 %v893_v9, %v825_v0  ;;  %4427 = vst [vmem:[#allocation18_spill] sm:$0xff] %v3198_v49  ;;  %v726_v1 = vadd.f32 %v694_v52, %v594_v15  ;;  %v3213_v15 = vld [vmem:[#allocation2 + $0x48] sm:$0xff] }
  0x97   : > { %v1393_v34 = vmul.f32 %v3116_v48, %v1357_v21  ;;  %v1394_v35 = vmul.f32 %v3116_v48, %v1358_v22  ;;  %v727_v3 = vadd.f32 %v695_v56, %v595_v24  ;;  %v794_v63 = vmul.f32 %v1056_v4, %v3060_v25  ;;  %539 = vst [vmem:[#allocation2 + $0xe1] sm:$0xff] %v3191_v36  ;;  %v3215_v24 = vld [vmem:[#allocation2 + $0x50] sm:$0xff] }
  0x98   : > { %v795_v0 = vmul.f32 %v1057_v10, %v3060_v25  ;;  %540 = vst [vmem:[#allocation2 + $0xf1] sm:$0xff] %v3195_v40  ;;  %541 = vst [vmem:[#allocation2 + $0xf9] sm:$0xff] %v3198_v49  ;;  %v1024_v8 = vadd.f32 %v3090_v41, %v924_v33  ;;  %v1025_v9 = vadd.f32 %v3093_v42, %v925_v13  ;;  %v3223_v13 = vld [vmem:[#allocation2 + $0x4a] sm:$0xff] }
  0x99   : > { %v894_v5 = vmul.f32 %v1157_v12, %v3062_v26  ;;  %v895_v2 = vmul.f32 %v1158_v14, %v3062_v26  ;;  %v826_v52 = vadd.f32 %v794_v63, %v726_v1  ;;  %v1094_v4 = vmul.f32 %v1357_v21, %v3068_v30  ;;  %v3225_v1 = vld [vmem:[#allocation2 + $0x52] sm:$0xff] }
  0x9a   : > { %v827_v56 = vadd.f32 %v795_v0, %v727_v3  ;;  %v1095_v10 = vmul.f32 %v1358_v22, %v3068_v30  ;;  %v1124_v41 = vadd.f32 %v1092_v11, %v1024_v8  ;;  %v1125_v42 = vadd.f32 %v1093_v16, %v1025_v9  ;;  %v2590_v3 = vld [vmem:[#allocation6 + $0x38] sm:$0xff]  }
  0x9b   : > { %v1195_v33 = vmul.f32 %v3070_v31, %v3213_v15  ;;  %v1196_v27 = vmul.f32 %v3070_v31, %v3215_v24  ;;  %v926_v63 = vadd.f32 %v894_v5, %v826_v52  ;;  %v3229_v49 = vmul.f32 %v3116_v48, %v3223_v13  ;;  %2456 = vmatprep.subr.bf16.mxu0 %v2590_v3 }
  0x9c   : > { %v927_v0 = vadd.f32 %v895_v2, %v827_v56  ;;  %v3233_v11 = vmul.f32 %v3116_v48, %v3225_v1  ;;  %v1225_v16 = vadd.f32 %v1193_v17, %v1124_v41  ;;  %v1226_v8 = vadd.f32 %v1194_v19, %v1125_v42  ;;  %2497 = vmatprep.subr.bf16.mxu1 %v2590_v3 }
  0x9d   : > { %v596_v9 = vmul.f32 %v1157_v12, %v3056_v20  ;;  %v597_v40 = vmul.f32 %v1158_v14, %v3056_v20  ;;  %v1026_v36 = vadd.f32 %v3140_v57, %v926_v63  ;;  %v697_v5 = vmul.f32 %v3058_v23, %v3047_v18  ;;  %2457 = vmatpush3.bf16.msra.mxu0 %v2590_v3  ;;  %v3277_v63 = vld [vmem:[%s3019_s15 + $0xb0] sm:$0xff] }
  0x9e   : > { %v1027_v2 = vadd.f32 %v3144_v58, %v927_v0  ;;  %v796_v52 = vmul.f32 %v1357_v21, %v3060_v25  ;;  %v1325_v17 = vadd.f32 %v3097_v43, %v1225_v16  ;;  %v1326_v19 = vadd.f32 %v3120_v51, %v1226_v8  ;;  %v3280_v0 = vld [vmem:[%s3019_s15 + $0xb8] sm:$0xff]  ;;  %544 = vst [vmem:[#allocation2 + $0x121] sm:$0xff] %v3277_v63 }
  0x9f   : > { %v728_v12 = vadd.f32 %v3169_v7, %v596_v9  ;;  %v797_v14 = vmul.f32 %v1358_v22, %v3060_v25  ;;  %v1126_v18 = vadd.f32 %v1094_v4, %v1026_v36  ;;  %v729_v58 = vadd.f32 %v697_v5, %v597_v40  ;;  %v3259_v22 = vld [vmem:[%s4356_s3] ss:$0 sm:$0xff]  ;;  %545 = vst [vmem:[#allocation2 + $0x129] sm:$0xff] %v3280_v0  ;;  %v3290_v5 = vld [vmem:[%s3019_s15 + $0xc0] sm:$0xff] }
  0xa0   : > { %v1127_v57 = vadd.f32 %v1095_v10, %v1027_v2  ;;  %v896_v21 = vmul.f32 %v3213_v15, %v3062_v26  ;;  %v1425_v43 = vadd.f32 %v1393_v34, %v1325_v17  ;;  %v1426_v56 = vadd.f32 %v1394_v35, %v1326_v19  ;;  %v3264_v35 = vld [vmem:[%s3019_s15 + $0xa0] sm:$0xff]  ;;  %2505 = vmatpush3.bf16.msra.mxu1 %v2590_v3 }
  0xa1   : > { %v828_v51 = vadd.f32 %v796_v52, %v728_v12  ;;  %v897_v7 = vmul.f32 %v3215_v24, %v3062_v26  ;;  %v1227_v36 = vadd.f32 %v1195_v33, %v1126_v18  ;;  %v829_v4 = vadd.f32 %v797_v14, %v729_v58  ;;  %v3270_v33 = vld [vmem:[#allocation2 + $0x60] sm:$0xff]  ;;  %542 = vst [vmem:[#allocation2 + $0x109] sm:$0xff] %v3264_v35  ;;  %v3293_v52 = vld [vmem:[%s3019_s15 + $0xc8] sm:$0xff]  ;;  %v3305_v14 = vld [vmem:[%s3019_s15 + $0xd8] sm:$0xff] }
  0xa2   : > { %v1228_v40 = vadd.f32 %v1196_v27, %v1127_v57  ;;  %v996_v34 = vmul.f32 %v3066_v29, %v3080_v37  ;;  %v1464_v10 = vmul.f32 %v3250_v47, %v1425_v43  ;;  %v1465_v50 = vmul.f32 %v3250_v47, %v1426_v56  ;;  %v3273_v27 = vld [vmem:[%s3019_s15 + $0xa8] sm:$0xff]  ;;  %546 = vst [vmem:[#allocation2 + $0x139] sm:$0xff] %v3290_v5  ;;  %v517_v18 = vld [vmem:[%s3019_s15 + $0xe0] sm:$0xff]  ;;  %v3312_v56 = vld [vmem:[#allocation2 + $0x68] sm:$0xff] }
  0xa3   : > { %v928_v41 = vadd.f32 %v896_v21, %v828_v51  ;;  %v997_v42 = vmul.f32 %v3066_v29, %v3083_v38  ;;  %v1327_v16 = vadd.f32 %v3148_v59, %v1227_v36  ;;  %v929_v9 = vadd.f32 %v897_v7, %v829_v4  ;;  %543 = vst [vmem:[#allocation2 + $0x111] sm:$0xff] %v3273_v27  ;;  %v3296_v59 = vld [vmem:[%s3019_s15 + $0xd0] sm:$0xff]  ;;  %v518_v57 = vld [vmem:[%s3019_s15 + $0xe8] sm:$0xff]  ;;  %v520_v7 = vld [vmem:[%s3019_s15 + $0xf8] sm:$0xff] }
  0xa4   : > { %v1328_v8 = vadd.f32 %v3165_v6, %v1228_v40  ;;  %v1096_v2 = vmul.f32 %v3223_v13, %v3068_v30  ;;  %v1503_v6 = vadd.f32 %v3259_v22, %v1464_v10  ;;  %v1504_v17 = vadd.f32 %v3259_v22, %v1465_v50  ;;  %547 = vst [vmem:[#allocation2 + $0x141] sm:$0xff] %v3293_v52  ;;  %v519_v51 = vld [vmem:[%s3019_s15 + $0xf0] sm:$0xff]  ;;  %s4457_s15 = sld [smem:[#allocation19_spill]] }
  0xa5   : > { %v1028_v19 = vadd.f32 %v996_v34, %v928_v41  ;;  %v1097_v12 = vmul.f32 %v3225_v1, %v3068_v30  ;;  %548 = vst [vmem:[#allocation2 + $0x151] sm:$0xff] %v3296_v59  ;;  %v1427_v58 = vadd.f32 %v3229_v49, %v1327_v16  ;;  %v1029_v43 = vadd.f32 %v997_v42, %v929_v9  ;;  %v1361_v41 = vld [vmem:[#allocation2 + $0x62] sm:$0xff]  ;;  %v1362_v9 = vld [vmem:[#allocation2 + $0x6a] sm:$0xff] }
  0xa6   : > { %v1428_v21 = vadd.f32 %v3233_v11, %v1328_v8  ;;  %v1197_v3 = vmul.f32 %v3070_v31, %v3270_v33  ;;  %549 = vst [vmem:[#allocation2 + $0x159] sm:$0xff] %v3305_v14  ;;  %550 = vst [vmem:[#allocation2 + $0x169] sm:$0xff] %v517_v18  ;;  %v1535_v36 = vmax.f32 %v1503_v6, 0.0  ;;  %v1536_v40 = vmax.f32 %v1504_v17, 0.0 }
  0xa7   : > { %551 = vst [vmem:[#allocation2 + $0x171] sm:$0xff] %v518_v57  ;;  %v1128_v4 = vadd.f32 %v1096_v2, %v1028_v19  ;;  %v1198_v49 = vmul.f32 %v3070_v31, %v3312_v56  ;;  %552 = vst [vmem:[#allocation2 + $0x181] sm:$0xff] %v519_v51  ;;  %v1466_v11 = vmul.f32 %v3250_v47, %v1427_v58 }
  0xa8   : > { %553 = vst [vmem:[#allocation2 + $0x189] sm:$0xff] %v520_v7  ;;  %v1467_v34 = vmul.f32 %v3250_v47, %v1428_v21  ;;  %v1129_v10 = vadd.f32 %v1097_v12, %v1029_v43  ;;  %v1297_v50 = vmul.f32 %v3072_v32, %v3086_v39  ;;  %v1567_v42 = vpack.c.bf16 %v1536_v40, %v1535_v36 }
  0xa9   : > { %v1229_v16 = vadd.f32 %v1197_v3, %v1128_v4  ;;  %v1298_v8 = vmul.f32 %v3072_v32, %v3102_v44  ;;  %v1397_v2 = vmul.f32 %v3116_v48, %v1361_v41  ;;  %v1505_v6 = vadd.f32 %v3259_v22, %v1466_v11 }
  0xaa   : > { %v1506_v17 = vadd.f32 %v3259_v22, %v1467_v34  ;;  %v1230_v19 = vadd.f32 %v1198_v49, %v1129_v10  ;;  %v1398_v18 = vmul.f32 %v3116_v48, %v1362_v9  ;;  %2458 = vmatprep.mubr.bf16.mxu0 %v1567_v42  ;;  %v598_v57 = vmul.f32 %v3213_v15, %v3056_v20  ;;  %s4287_s23 = scalar_lea.hbm %s4457_s15, %s2417_s22 }
  0xab   : > { %v1329_v12 = vadd.f32 %v1297_v50, %v1229_v16  ;;  %v599_v58 = vmul.f32 %v3215_v24, %v3056_v20  ;;  %v698_v21 = vmul.f32 %v3058_v23, %v3080_v37  ;;  %v1537_v43 = vmax.f32 %v1505_v6, 0.0 }
  0xac   : > { %v1538_v3 = vmax.f32 %v1506_v17, 0.0  ;;  %v1330_v51 = vadd.f32 %v1298_v8, %v1230_v19  ;;  %v699_v7 = vmul.f32 %v3058_v23, %v3083_v38  ;;  %v798_v4 = vmul.f32 %v3223_v13, %v3060_v25  ;;  %v1163_v8 = vld [vmem:[#allocation2 + $0x78] sm:$0xff]  ;;  %v1164_v19 = vld [vmem:[#allocation2 + $0x80] sm:$0xff] }
  0xad   : > { %v1429_v36 = vadd.f32 %v1397_v2, %v1329_v12  ;;  %v730_v40 = vadd.f32 %v698_v21, %v598_v57  ;;  %v799_v15 = vmul.f32 %v3225_v1, %v3060_v25  ;;  %v898_v37 = vmul.f32 %v3270_v33, %v3062_v26 }
  0xae   : > { %v1568_v49 = vpack.c.bf16 %v1538_v3, %v1537_v43  ;;  %v1430_v11 = vadd.f32 %v1398_v18, %v1330_v51  ;;  %v731_v24 = vadd.f32 %v699_v7, %v599_v58  ;;  %v899_v38 = vmul.f32 %v3312_v56, %v3062_v26  ;;  %v1363_v43 = vld [vmem:[#allocation2 + $0x7a] sm:$0xff] }
  0xaf   : > { %v1468_v34 = vmul.f32 %v3250_v47, %v1429_v36  ;;  %v830_v10 = vadd.f32 %v798_v4, %v730_v40  ;;  %v998_v50 = vmul.f32 %v3066_v29, %v3086_v39  ;;  %v999_v1 = vmul.f32 %v3066_v29, %v3102_v44  ;;  %v1364_v36 = vld [vmem:[#allocation2 + $0x82] sm:$0xff] }
  0xb0   : > { %2459 = vmatmul.mubr.bf16.vlgmr.msra.gmra.mrb[0].mxu0 %v1568_v49  ;;  %v1469_v13 = vmul.f32 %v3250_v47, %v1430_v11  ;;  %v831_v42 = vadd.f32 %v799_v15, %v731_v24  ;;  %v1098_v16 = vmul.f32 %v1361_v41, %v3068_v30  ;;  %v1099_v17 = vmul.f32 %v1362_v9, %v3068_v30 }
  0xb1   : > { %v1507_v2 = vadd.f32 %v3259_v22, %v1468_v34  ;;  %v930_v6 = vadd.f32 %v898_v37, %v830_v10  ;;  %v1199_v18 = vmul.f32 %v3070_v31, %v1163_v8  ;;  %v1200_v58 = vmul.f32 %v3070_v31, %v1164_v19 }
  0xb2   : > { %v1508_v12 = vadd.f32 %v3259_v22, %v1469_v13  ;;  %v931_v57 = vadd.f32 %v899_v38, %v831_v42  ;;  %v1299_v21 = vmul.f32 %v3072_v32, %v3106_v45  ;;  %v1300_v7 = vmul.f32 %v3072_v32, %v3109_v46 }
  0xb3   : > { %v1539_v3 = vmax.f32 %v1507_v2, 0.0  ;;  %v1030_v51 = vadd.f32 %v998_v50, %v930_v6  ;;  %v1399_v40 = vmul.f32 %v3116_v48, %v1363_v43  ;;  %v1400_v49 = vmul.f32 %v3116_v48, %v1364_v36 }
  0xb4   : > { %v1540_v4 = vmax.f32 %v1508_v12, 0.0  ;;  %v1031_v15 = vadd.f32 %v999_v1, %v931_v57  ;;  %v600_v11 = vmul.f32 %v3270_v33, %v3056_v20  ;;  %v601_v37 = vmul.f32 %v3312_v56, %v3056_v20  ;;  %v3384_v57 = vld [vmem:[#allocation2 + $0x98] sm:$0xff] }
  0xb5   : > { %v1130_v24 = vadd.f32 %v1098_v16, %v1030_v51  ;;  %v700_v34 = vmul.f32 %v3058_v23, %v3086_v39  ;;  %v701_v10 = vmul.f32 %v3058_v23, %v3102_v44  ;;  %v800_v13 = vmul.f32 %v1361_v41, %v3060_v25 }
  0xb6   : > { %v1569_v38 = vpack.c.bf16 %v1540_v4, %v1539_v3  ;;  %v1131_v50 = vadd.f32 %v1099_v17, %v1031_v15  ;;  %v801_v42 = vmul.f32 %v1362_v9, %v3060_v25  ;;  %v900_v33 = vmul.f32 %v1163_v8, %v3062_v26 }
  0xb7   : > { %v1231_v1 = vadd.f32 %v1199_v18, %v1130_v24  ;;  %v732_v2 = vadd.f32 %v700_v34, %v600_v11  ;;  %v733_v6 = vadd.f32 %v701_v10, %v601_v37  ;;  %v901_v56 = vmul.f32 %v1164_v19, %v3062_v26  ;;  %v3382_v18 = vld [vmem:[#allocation2 + $0x90] sm:$0xff]  ;;  %v3395_v34 = vld [vmem:[#allocation2 + $0x9a] sm:$0xff] }
  0xb8   : > { %2462 = vmatprep.mubr.bf16.mxu0 %v1569_v38  ;;  %v1232_v16 = vadd.f32 %v1200_v58, %v1131_v50  ;;  %v1000_v39 = vmul.f32 %v3066_v29, %v3106_v45  ;;  %v1001_v44 = vmul.f32 %v3066_v29, %v3109_v46  ;;  %v1100_v9 = vmul.f32 %v1363_v43, %v3068_v30  ;;  %v3393_v37 = vld [vmem:[#allocation2 + $0x92] sm:$0xff] }
  0xb9   : > { %v1331_v17 = vadd.f32 %v1299_v21, %v1231_v1  ;;  %v832_v12 = vadd.f32 %v800_v13, %v732_v2  ;;  %v833_v41 = vadd.f32 %v801_v42, %v733_v6  ;;  %v1101_v58 = vmul.f32 %v1364_v36, %v3068_v30 }
  0xba   : > { %v1332_v3 = vadd.f32 %v1300_v7, %v1232_v16  ;;  %v1201_v51 = vmul.f32 %v3070_v31, %v3382_v18  ;;  %v1202_v4 = vmul.f32 %v3070_v31, %v3384_v57  ;;  %v1301_v24 = vmul.f32 %v3072_v32, %v3128_v53 }
  0xbb   : > { %v1431_v15 = vadd.f32 %v1399_v40, %v1331_v17  ;;  %v932_v11 = vadd.f32 %v900_v33, %v832_v12  ;;  %v933_v21 = vadd.f32 %v901_v56, %v833_v41  ;;  %v1302_v7 = vmul.f32 %v3072_v32, %v3131_v54 }
  0xbc   : > { %v1432_v10 = vadd.f32 %v1400_v49, %v1332_v3  ;;  %v1401_v38 = vmul.f32 %v3116_v48, %v3393_v37  ;;  %v1402_v50 = vmul.f32 %v3116_v48, %v3395_v34  ;;  %v602_v1 = vmul.f32 %v1163_v8, %v3056_v20 }
  0xbd   : > { %v1470_v40 = vmul.f32 %v3250_v47, %v1431_v15  ;;  %v1032_v13 = vadd.f32 %v1000_v39, %v932_v11  ;;  %v1033_v42 = vadd.f32 %v1001_v44, %v933_v21  ;;  %v603_v6 = vmul.f32 %v1164_v19, %v3056_v20 }
  0xbe   : > { %v1471_v2 = vmul.f32 %v3250_v47, %v1432_v10  ;;  %v702_v49 = vmul.f32 %v3058_v23, %v3106_v45  ;;  %v703_v33 = vmul.f32 %v3058_v23, %v3109_v46  ;;  %v802_v12 = vmul.f32 %v1363_v43, %v3060_v25 }
  0xbf   : > { %v1509_v16 = vadd.f32 %v3259_v22, %v1470_v40  ;;  %v1132_v56 = vadd.f32 %v1100_v9, %v1032_v13  ;;  %v1133_v17 = vadd.f32 %v1101_v58, %v1033_v42  ;;  %v803_v41 = vmul.f32 %v1364_v36, %v3060_v25  ;;  %v3425_v42 = vld [vmem:[#allocation2 + $0xa8] sm:$0xff] }
  0xc0   : > { %v1510_v39 = vadd.f32 %v3259_v22, %v1471_v2  ;;  %v734_v44 = vadd.f32 %v702_v49, %v602_v1  ;;  %v735_v8 = vadd.f32 %v703_v33, %v603_v6  ;;  %v902_v45 = vmul.f32 %v3382_v18, %v3062_v26 }
  0xc1   : > { %v1541_v3 = vmax.f32 %v1509_v16, 0.0  ;;  %v1233_v19 = vadd.f32 %v1201_v51, %v1132_v56  ;;  %v1234_v15 = vadd.f32 %v1202_v4, %v1133_v17  ;;  %v903_v9 = vmul.f32 %v3384_v57, %v3062_v26  ;;  %v3437_v17 = vld [vmem:[#allocation2 + $0xaa] sm:$0xff] }
  0xc2   : > { %v1542_v11 = vmax.f32 %v1510_v39, 0.0  ;;  %v834_v46 = vadd.f32 %v802_v12, %v734_v44  ;;  %v835_v21 = vadd.f32 %v803_v41, %v735_v8  ;;  %v1002_v10 = vmul.f32 %v3066_v29, %v3128_v53  ;;  %v1368_v39 = vld [vmem:[#allocation2 + $0xb2] sm:$0xff] }
  0xc3   : > { %v1333_v58 = vadd.f32 %v1301_v24, %v1233_v19  ;;  %v1334_v43 = vadd.f32 %v1302_v7, %v1234_v15  ;;  %v1003_v36 = vmul.f32 %v3066_v29, %v3131_v54  ;;  %v1102_v13 = vmul.f32 %v3393_v37, %v3068_v30  ;;  %v3429_v7 = vld [vmem:[#allocation2 + $0xb0] sm:$0xff] }
  0xc4   : > { %v1570_v40 = vpack.c.bf16 %v1542_v11, %v1541_v3  ;;  %v934_v51 = vadd.f32 %v902_v45, %v834_v46  ;;  %v935_v4 = vadd.f32 %v903_v9, %v835_v21  ;;  %v1103_v24 = vmul.f32 %v3395_v34, %v3068_v30 }
  0xc5   : > { %v1433_v1 = vadd.f32 %v1401_v38, %v1333_v58  ;;  %v1434_v2 = vadd.f32 %v1402_v50, %v1334_v43  ;;  %v1203_v6 = vmul.f32 %v3070_v31, %v3425_v42  ;;  %v1204_v16 = vmul.f32 %v3070_v31, %v3429_v7 }
  0xc6   : > { %2463 = vmatmul.mubr.bf16.gmra.mrb[4].mxu0 %v1570_v40  ;;  %v1034_v49 = vadd.f32 %v1002_v10, %v934_v51  ;;  %v1035_v33 = vadd.f32 %v1003_v36, %v935_v4  ;;  %v1303_v56 = vmul.f32 %v3072_v32, %v3134_v55  ;;  %v1304_v12 = vmul.f32 %v3072_v32, %v3153_v60 }
  0xc7   : > { %v1472_v38 = vmul.f32 %v3250_v47, %v1433_v1  ;;  %v1473_v50 = vmul.f32 %v3250_v47, %v1434_v2  ;;  %v1403_v44 = vmul.f32 %v3116_v48, %v3437_v17  ;;  %v1404_v3 = vmul.f32 %v3116_v48, %v1368_v39 }
  0xc8   : > { %v1134_v8 = vadd.f32 %v1102_v13, %v1034_v49  ;;  %v1135_v41 = vadd.f32 %v1103_v24, %v1035_v33  ;;  %v604_v19 = vmul.f32 %v3382_v18, %v3056_v20  ;;  %v605_v11 = vmul.f32 %v3384_v57, %v3056_v20  ;;  %v3468_v49 = vld [vmem:[#allocation2 + $0xc0] sm:$0xff] }
  0xc9   : > { %v1511_v15 = vadd.f32 %v3259_v22, %v1472_v38  ;;  %v1512_v45 = vadd.f32 %v3259_v22, %v1473_v50  ;;  %v704_v46 = vmul.f32 %v3058_v23, %v3128_v53  ;;  %v705_v58 = vmul.f32 %v3058_v23, %v3131_v54  ;;  %v3473_v38 = vld [vmem:[#allocation2 + $0xc8] sm:$0xff] }
  0xca   : > { %v1235_v21 = vadd.f32 %v1203_v6, %v1134_v8  ;;  %v1236_v9 = vadd.f32 %v1204_v16, %v1135_v41  ;;  %v804_v43 = vmul.f32 %v3393_v37, %v3060_v25  ;;  %v805_v40 = vmul.f32 %v3395_v34, %v3060_v25 }
  0xcb   : > { %v1543_v10 = vmax.f32 %v1511_v15, 0.0  ;;  %v1544_v18 = vmax.f32 %v1512_v45, 0.0  ;;  %v736_v36 = vadd.f32 %v704_v46, %v604_v19  ;;  %v737_v57 = vadd.f32 %v705_v58, %v605_v11  ;;  %v1370_v11 = vld [vmem:[#allocation2 + $0xca] sm:$0xff] }
  0xcc   : > { %v1335_v51 = vadd.f32 %v1303_v56, %v1235_v21  ;;  %v1336_v4 = vadd.f32 %v1304_v12, %v1236_v9  ;;  %v904_v53 = vmul.f32 %v3425_v42, %v3062_v26  ;;  %v905_v54 = vmul.f32 %v3429_v7, %v3062_v26 }
  0xcd   : > { %v1571_v13 = vpack.c.bf16 %v1544_v18, %v1543_v10  ;;  %v836_v1 = vadd.f32 %v804_v43, %v736_v36  ;;  %v1004_v37 = vmul.f32 %v3066_v29, %v3134_v55  ;;  %v837_v6 = vadd.f32 %v805_v40, %v737_v57 }
  0xce   : > { %v1435_v2 = vadd.f32 %v1403_v44, %v1335_v51  ;;  %v1436_v24 = vadd.f32 %v1404_v3, %v1336_v4  ;;  %v1005_v34 = vmul.f32 %v3066_v29, %v3153_v60  ;;  %v1104_v16 = vmul.f32 %v3437_v17, %v3068_v30  ;;  %v1369_v3 = vld [vmem:[#allocation2 + $0xc2] sm:$0xff] }
  0xcf   : > { %2466 = vmatprep.mubr.bf16.mxu0 %v1571_v13  ;;  %v936_v33 = vadd.f32 %v904_v53, %v836_v1  ;;  %v1105_v56 = vmul.f32 %v1368_v39, %v3068_v30  ;;  %v1205_v50 = vmul.f32 %v3070_v31, %v3468_v49  ;;  %v937_v8 = vadd.f32 %v905_v54, %v837_v6 }
  0xd0   : > { %v1474_v12 = vmul.f32 %v3250_v47, %v1435_v2  ;;  %v1475_v44 = vmul.f32 %v3250_v47, %v1436_v24  ;;  %v1206_v41 = vmul.f32 %v3070_v31, %v3473_v38  ;;  %v1305_v15 = vmul.f32 %v3072_v32, %v3157_v61 }
  0xd1   : > { %v1036_v19 = vadd.f32 %v1004_v37, %v936_v33  ;;  %v1306_v45 = vmul.f32 %v3072_v32, %v3160_v62  ;;  %v1405_v46 = vmul.f32 %v3116_v48, %v1369_v3  ;;  %v1037_v58 = vadd.f32 %v1005_v34, %v937_v8  ;;  %v3512_v8 = vld [vmem:[#allocation2 + $0xe0] sm:$0xff] }
  0xd2   : > { %v1513_v21 = vadd.f32 %v3259_v22, %v1474_v12  ;;  %v1514_v9 = vadd.f32 %v3259_v22, %v1475_v44  ;;  %v1406_v43 = vmul.f32 %v3116_v48, %v1370_v11  ;;  %v606_v18 = vmul.f32 %v3425_v42, %v3056_v20 }
  0xd3   : > { %v1136_v10 = vadd.f32 %v1104_v16, %v1036_v19  ;;  %v607_v36 = vmul.f32 %v3429_v7, %v3056_v20  ;;  %v706_v40 = vmul.f32 %v3058_v23, %v3134_v55  ;;  %v1137_v57 = vadd.f32 %v1105_v56, %v1037_v58  ;;  %v3509_v56 = vld [vmem:[#allocation2 + $0xd8] sm:$0xff] }
  0xd4   : > { %v1545_v51 = vmax.f32 %v1513_v21, 0.0  ;;  %v1546_v4 = vmax.f32 %v1514_v9, 0.0  ;;  %v707_v53 = vmul.f32 %v3058_v23, %v3153_v60  ;;  %v806_v54 = vmul.f32 %v3437_v17, %v3060_v25  ;;  %v3520_v9 = vld [vmem:[#allocation2 + $0xda] sm:$0xff] }
  0xd5   : > { %v1237_v13 = vadd.f32 %v1205_v50, %v1136_v10  ;;  %v738_v1 = vadd.f32 %v706_v40, %v606_v18  ;;  %v807_v37 = vmul.f32 %v1368_v39, %v3060_v25  ;;  %v1238_v2 = vadd.f32 %v1206_v41, %v1137_v57  ;;  %v4428_v10 = vld [vmem:[#allocation16_spill] sm:$0xff] }
  0xd6   : > { %v1572_v42 = vpack.c.bf16 %v1546_v4, %v1545_v51  ;;  %v739_v24 = vadd.f32 %v707_v53, %v607_v36  ;;  %v906_v7 = vmul.f32 %v3468_v49, %v3062_v26  ;;  %v907_v34 = vmul.f32 %v3473_v38, %v3062_v26  ;;  %v1372_v36 = vld [vmem:[#allocation2 + $0xe2] sm:$0xff] }
  0xd7   : > { %v1337_v55 = vadd.f32 %v1305_v15, %v1237_v13  ;;  %v838_v6 = vadd.f32 %v806_v54, %v738_v1  ;;  %v1006_v60 = vmul.f32 %v3066_v29, %v3157_v61  ;;  %v1338_v33 = vadd.f32 %v1306_v45, %v1238_v2 }
  0xd8   : > { %2467 = vmatmul.mubr.bf16.gmra.mrb[8].mxu0 %v1572_v42  ;;  %v839_v16 = vadd.f32 %v807_v37, %v739_v24  ;;  %v1007_v17 = vmul.f32 %v3066_v29, %v3160_v62  ;;  %v1106_v39 = vmul.f32 %v1369_v3, %v3068_v30  ;;  %v1107_v44 = vmul.f32 %v1370_v11, %v3068_v30 }
  0xd9   : > { %v1437_v50 = vadd.f32 %v1405_v46, %v1337_v55  ;;  %v938_v12 = vadd.f32 %v906_v7, %v838_v6  ;;  %v1207_v41 = vmul.f32 %v3070_v31, %v3509_v56  ;;  %v1438_v19 = vadd.f32 %v1406_v43, %v1338_v33 }
  0xda   : > { %v939_v15 = vadd.f32 %v907_v34, %v839_v16  ;;  %v1208_v45 = vmul.f32 %v3070_v31, %v3512_v8  ;;  %v1307_v21 = vmul.f32 %v3072_v32, %v3185_v28  ;;  %v1308_v18 = vmul.f32 %v3072_v32, %v4428_v10 }
  0xdb   : > { %v1476_v46 = vmul.f32 %v3250_v47, %v1437_v50  ;;  %v1038_v58 = vadd.f32 %v1006_v60, %v938_v12  ;;  %v1407_v40 = vmul.f32 %v3116_v48, %v3520_v9  ;;  %v1477_v43 = vmul.f32 %v3250_v47, %v1438_v19 }
  0xdc   : > { %v1039_v51 = vadd.f32 %v1007_v17, %v939_v15  ;;  %v1408_v4 = vmul.f32 %v3116_v48, %v1372_v36  ;;  %v608_v57 = vmul.f32 %v3468_v49, %v3056_v20  ;;  %v609_v1 = vmul.f32 %v3473_v38, %v3056_v20  ;;  %v3552_v15 = vld [vmem:[#allocation2 + $0xf0] sm:$0xff] }
  0xdd   : > { %v1515_v53 = vadd.f32 %v3259_v22, %v1476_v46  ;;  %v1138_v13 = vadd.f32 %v1106_v39, %v1038_v58  ;;  %v708_v54 = vmul.f32 %v3058_v23, %v3157_v61  ;;  %v1516_v37 = vadd.f32 %v3259_v22, %v1477_v43 }
  0xde   : > { %v1139_v42 = vadd.f32 %v1107_v44, %v1039_v51  ;;  %v709_v2 = vmul.f32 %v3058_v23, %v3160_v62  ;;  %v808_v24 = vmul.f32 %v1369_v3, %v3060_v25  ;;  %v809_v6 = vmul.f32 %v1370_v11, %v3060_v25  ;;  %v4429_v51 = vld [vmem:[#allocation17_spill] sm:$0xff] }
  0xdf   : > { %v1547_v7 = vmax.f32 %v1515_v53, 0.0  ;;  %v1239_v55 = vadd.f32 %v1207_v41, %v1138_v13  ;;  %v740_v49 = vadd.f32 %v708_v54, %v608_v57  ;;  %v1548_v34 = vmax.f32 %v1516_v37, 0.0  ;;  %v4430_v53 = vld [vmem:[#allocation18_spill] sm:$0xff]  ;;  %v1374_v54 = vld [vmem:[#allocation2 + $0xfa] sm:$0xff] }
  0xe0   : > { %v1240_v60 = vadd.f32 %v1208_v45, %v1139_v42  ;;  %v741_v33 = vadd.f32 %v709_v2, %v609_v1  ;;  %v908_v38 = vmul.f32 %v3509_v56, %v3062_v26  ;;  %v909_v17 = vmul.f32 %v3512_v8, %v3062_v26  ;;  %v3554_v45 = vld [vmem:[#allocation2 + $0xf8] sm:$0xff] }
  0xe1   : > { %v1339_v61 = vadd.f32 %v1307_v21, %v1239_v55  ;;  %v840_v16 = vadd.f32 %v808_v24, %v740_v49  ;;  %v1008_v62 = vmul.f32 %v3066_v29, %v3185_v28  ;;  %v1573_v3 = vpack.c.bf16 %v1548_v34, %v1547_v7  ;;  %v1373_v1 = vld [vmem:[#allocation2 + $0xf2] sm:$0xff] }
  0xe2   : > { %v1340_v39 = vadd.f32 %v1308_v18, %v1240_v60  ;;  %v841_v50 = vadd.f32 %v809_v6, %v741_v33  ;;  %v1009_v11 = vmul.f32 %v3066_v29, %v4428_v10  ;;  %v1108_v41 = vmul.f32 %v3520_v9, %v3068_v30 }
  0xe3   : > { %v1439_v12 = vadd.f32 %v1407_v40, %v1339_v61  ;;  %v940_v44 = vadd.f32 %v908_v38, %v840_v16  ;;  %v1109_v19 = vmul.f32 %v1372_v36, %v3068_v30  ;;  %2470 = vmatprep.mubr.bf16.mxu0 %v1573_v3  ;;  %v1209_v58 = vmul.f32 %v3070_v31, %v3552_v15 }
  0xe4   : > { %v1440_v21 = vadd.f32 %v1408_v4, %v1340_v39  ;;  %v941_v46 = vadd.f32 %v909_v17, %v841_v50  ;;  %v1210_v18 = vmul.f32 %v3070_v31, %v3554_v45  ;;  %v1309_v57 = vmul.f32 %v3072_v32, %v4429_v51 }
  0xe5   : > { %v1478_v40 = vmul.f32 %v3250_v47, %v1439_v12  ;;  %v1040_v43 = vadd.f32 %v1008_v62, %v940_v44  ;;  %v1310_v13 = vmul.f32 %v3072_v32, %v4430_v53  ;;  %v1409_v42 = vmul.f32 %v3116_v48, %v1373_v1 }
  0xe6   : > { %v1479_v4 = vmul.f32 %v3250_v47, %v1440_v21  ;;  %v1041_v37 = vadd.f32 %v1009_v11, %v941_v46  ;;  %v1410_v2 = vmul.f32 %v3116_v48, %v1374_v54  ;;  %v610_v55 = vmul.f32 %v3509_v56, %v3056_v20  ;;  %v3591_v46 = vld [vmem:[#allocation2 + $0x108] sm:$0xff] }
  0xe7   : > { %v1517_v24 = vadd.f32 %v3259_v22, %v1478_v40  ;;  %v1140_v7 = vadd.f32 %v1108_v41, %v1040_v43  ;;  %v611_v49 = vmul.f32 %v3512_v8, %v3056_v20  ;;  %v710_v60 = vmul.f32 %v3058_v23, %v3185_v28  ;;  %v1176_v43 = vld [vmem:[#allocation2 + $0x110] sm:$0xff] }
  0xe8   : > { %v1518_v6 = vadd.f32 %v3259_v22, %v1479_v4  ;;  %v1141_v34 = vadd.f32 %v1109_v19, %v1041_v37  ;;  %v711_v33 = vmul.f32 %v3058_v23, %v4428_v10  ;;  %v810_v16 = vmul.f32 %v3520_v9, %v3060_v25 }
  0xe9   : > { %v1549_v38 = vmax.f32 %v1517_v24, 0.0  ;;  %v1241_v61 = vadd.f32 %v1209_v58, %v1140_v7  ;;  %v811_v17 = vmul.f32 %v1372_v36, %v3060_v25  ;;  %v742_v3 = vadd.f32 %v710_v60, %v610_v55  ;;  %v1375_v24 = vld [vmem:[#allocation2 + $0x10a] sm:$0xff] }
  0xea   : > { %v1550_v56 = vmax.f32 %v1518_v6, 0.0  ;;  %v1242_v62 = vadd.f32 %v1210_v18, %v1141_v34  ;;  %v743_v8 = vadd.f32 %v711_v33, %v611_v49  ;;  %v910_v50 = vmul.f32 %v3552_v15, %v3062_v26  ;;  %v1376_v49 = vld [vmem:[#allocation2 + $0x112] sm:$0xff] }
  0xeb   : > { %v1341_v39 = vadd.f32 %v1309_v57, %v1241_v61  ;;  %v911_v28 = vmul.f32 %v3554_v45, %v3062_v26  ;;  %v1010_v10 = vmul.f32 %v3066_v29, %v4429_v51  ;;  %v842_v44 = vadd.f32 %v810_v16, %v742_v3 }
  0xec   : > { %v1574_v11 = vpack.c.bf16 %v1550_v56, %v1549_v38  ;;  %v1342_v12 = vadd.f32 %v1310_v13, %v1242_v62  ;;  %v843_v9 = vadd.f32 %v811_v17, %v743_v8  ;;  %v1011_v36 = vmul.f32 %v3066_v29, %v4430_v53 }
  0xed   : > { %v1441_v41 = vadd.f32 %v1409_v42, %v1341_v39  ;;  %v1110_v19 = vmul.f32 %v1373_v1, %v3068_v30  ;;  %v1111_v21 = vmul.f32 %v1374_v54, %v3068_v30  ;;  %v942_v18 = vadd.f32 %v910_v50, %v842_v44 }
  0xee   : > { %2471 = vmatmul.mubr.bf16.gmra.mrb[12].mxu0 %v1574_v11  ;;  %v1442_v58 = vadd.f32 %v1410_v2, %v1342_v12  ;;  %v943_v40 = vadd.f32 %v911_v28, %v843_v9  ;;  %v1211_v57 = vmul.f32 %v3070_v31, %v3591_v46  ;;  %v1212_v4 = vmul.f32 %v3070_v31, %v1176_v43 }
  0xef   : > { %v1480_v13 = vmul.f32 %v3250_v47, %v1441_v41  ;;  %v1311_v37 = vmul.f32 %v3072_v32, %v3264_v35  ;;  %v1312_v42 = vmul.f32 %v3072_v32, %v3273_v27  ;;  %v1042_v2 = vadd.f32 %v1010_v10, %v942_v18 }
  0xf0   : > { %v1481_v7 = vmul.f32 %v3250_v47, %v1442_v58  ;;  %v1043_v55 = vadd.f32 %v1011_v36, %v943_v40  ;;  %v1411_v6 = vmul.f32 %v3116_v48, %v1375_v24  ;;  %v1412_v60 = vmul.f32 %v3116_v48, %v1376_v49  ;;  %v3627_v40 = vld [vmem:[#allocation2 + $0x128] sm:$0xff] }
  0xf1   : > { %v1519_v34 = vadd.f32 %v3259_v22, %v1480_v13  ;;  %v612_v33 = vmul.f32 %v3552_v15, %v3056_v20  ;;  %v613_v38 = vmul.f32 %v3554_v45, %v3056_v20  ;;  %v1142_v16 = vadd.f32 %v1110_v19, %v1042_v2  ;;  %v3625_v19 = vld [vmem:[#allocation2 + $0x120] sm:$0xff] }
  0xf2   : > { %v1520_v61 = vadd.f32 %v3259_v22, %v1481_v7  ;;  %v1143_v17 = vadd.f32 %v1111_v21, %v1043_v55  ;;  %v712_v56 = vmul.f32 %v3058_v23, %v4429_v51  ;;  %v713_v3 = vmul.f32 %v3058_v23, %v4430_v53  ;;  %v3637_v7 = vld [vmem:[#allocation2 + $0x122] sm:$0xff] }
  0xf3   : > { %v1551_v62 = vmax.f32 %v1519_v34, 0.0  ;;  %v812_v8 = vmul.f32 %v1373_v1, %v3060_v25  ;;  %v813_v48 = vmul.f32 %v1374_v54, %v3060_v25  ;;  %v1243_v15 = vadd.f32 %v1211_v57, %v1142_v16  ;;  %v3641_v34 = vld [vmem:[#allocation2 + $0x12a] sm:$0xff] }
  0xf4   : > { %v1552_v39 = vmax.f32 %v1520_v61, 0.0  ;;  %v1244_v50 = vadd.f32 %v1212_v4, %v1143_v17  ;;  %v744_v28 = vadd.f32 %v712_v56, %v612_v33  ;;  %v745_v45 = vadd.f32 %v713_v3, %v613_v38 }
  0xf5   : > { %v912_v10 = vmul.f32 %v3591_v46, %v3062_v26  ;;  %v913_v11 = vmul.f32 %v1176_v43, %v3062_v26  ;;  %v1012_v51 = vmul.f32 %v3066_v29, %v3264_v35  ;;  %v1343_v44 = vadd.f32 %v1311_v37, %v1243_v15 }
  0xf6   : > { %v1575_v12 = vpack.c.bf16 %v1552_v39, %v1551_v62  ;;  %v1344_v53 = vadd.f32 %v1312_v42, %v1244_v50  ;;  %v844_v9 = vadd.f32 %v812_v8, %v744_v28  ;;  %v845_v1 = vadd.f32 %v813_v48, %v745_v45 }
  0xf7   : > { %v1013_v54 = vmul.f32 %v3066_v29, %v3273_v27  ;;  %v1112_v41 = vmul.f32 %v1375_v24, %v3068_v30  ;;  %v1113_v36 = vmul.f32 %v1376_v49, %v3068_v30  ;;  %v1443_v21 = vadd.f32 %v1411_v6, %v1343_v44 }
  0xf8   : > { %2474 = vmatprep.mubr.bf16.mxu1 %v1575_v12  ;;  %v1444_v58 = vadd.f32 %v1412_v60, %v1344_v53  ;;  %v944_v18 = vadd.f32 %v912_v10, %v844_v9  ;;  %v1213_v57 = vmul.f32 %v3070_v31, %v3625_v19  ;;  %v945_v13 = vadd.f32 %v913_v11, %v845_v1  ;;  %v3646_v60 = vld [vmem:[%s4354_s1 + $0x8] ss:$0 sm:$0xff] }
  0xf9   : > { %v1214_v4 = vmul.f32 %v3070_v31, %v3627_v40  ;;  %v1313_v37 = vmul.f32 %v3072_v32, %v3277_v63  ;;  %v1314_v42 = vmul.f32 %v3072_v32, %v3280_v0  ;;  %v1482_v2 = vmul.f32 %v3250_v47, %v1443_v21 }
  0xfa   : > { %v1483_v55 = vmul.f32 %v3250_v47, %v1444_v58  ;;  %v1044_v6 = vadd.f32 %v1012_v51, %v944_v18  ;;  %v1413_v33 = vmul.f32 %v3646_v60, %v3637_v7  ;;  %v1045_v38 = vadd.f32 %v1013_v54, %v945_v13  ;;  %v3673_v54 = vld [vmem:[#allocation2 + $0x138] sm:$0xff]  ;;  %v3677_v58 = vld [vmem:[#allocation2 + $0x140] sm:$0xff] }
  0xfb   : > { %v1414_v61 = vmul.f32 %v3646_v60, %v3641_v34  ;;  %v614_v16 = vmul.f32 %v3591_v46, %v3056_v20  ;;  %v615_v17 = vmul.f32 %v1176_v43, %v3056_v20  ;;  %v1521_v56 = vadd.f32 %v3259_v22, %v1482_v2 }
  0xfc   : > { %v1522_v62 = vadd.f32 %v3259_v22, %v1483_v55  ;;  %v1144_v3 = vadd.f32 %v1112_v41, %v1044_v6  ;;  %v714_v8 = vmul.f32 %v3058_v23, %v3264_v35  ;;  %v1145_v48 = vadd.f32 %v1113_v36, %v1045_v38 }
  0xfd   : > { %v715_v39 = vmul.f32 %v3058_v23, %v3273_v27  ;;  %v814_v15 = vmul.f32 %v1375_v24, %v3060_v25  ;;  %v815_v50 = vmul.f32 %v1376_v49, %v3060_v25  ;;  %v1553_v28 = vmax.f32 %v1521_v56, 0.0 }
  0xfe   : > { %v1554_v46 = vmax.f32 %v1522_v62, 0.0  ;;  %v1245_v45 = vadd.f32 %v1213_v57, %v1144_v3  ;;  %v746_v43 = vadd.f32 %v714_v8, %v614_v16  ;;  %v1246_v10 = vadd.f32 %v1214_v4, %v1145_v48 }
  0xff   : > { %v747_v11 = vadd.f32 %v715_v39, %v615_v17  ;;  %v914_v51 = vmul.f32 %v3625_v19, %v3062_v26  ;;  %v915_v35 = vmul.f32 %v3627_v40, %v3062_v26  ;;  %v1014_v27 = vmul.f32 %v3066_v29, %v3277_v63 }
 0x100   : > { %v1576_v12 = vpack.c.bf16 %v1554_v46, %v1553_v28  ;;  %v1345_v44 = vadd.f32 %v1313_v37, %v1245_v45  ;;  %v846_v53 = vadd.f32 %v814_v15, %v746_v43  ;;  %v1346_v24 = vadd.f32 %v1314_v42, %v1246_v10  ;;  %v3685_v42 = vld [vmem:[#allocation2 + $0x13a] sm:$0xff] }
 0x101   : > { %v847_v49 = vadd.f32 %v815_v50, %v747_v11  ;;  %v1015_v9 = vmul.f32 %v3066_v29, %v3280_v0  ;;  %v1114_v1 = vmul.f32 %v3637_v7, %v3068_v30  ;;  %v1115_v21 = vmul.f32 %v3641_v34, %v3068_v30 }
 0x102   : > { %2475 = vmatmul.mubr.bf16.vlgmr.msra.gmra.mrb[0].mxu1 %v1576_v12  ;;  %v1445_v41 = vadd.f32 %v1413_v33, %v1345_v44  ;;  %v946_v36 = vadd.f32 %v914_v51, %v846_v53  ;;  %v1215_v18 = vmul.f32 %v3070_v31, %v3673_v54  ;;  %v1446_v57 = vadd.f32 %v1414_v61, %v1346_v24  ;;  %v3690_v33 = vld [vmem:[#allocation2 + $0x142] sm:$0xff] }
 0x103   : > { %v947_v13 = vadd.f32 %v915_v35, %v847_v49  ;;  %v1216_v4 = vmul.f32 %v3070_v31, %v3677_v58  ;;  %v1315_v37 = vmul.f32 %v3072_v32, %v3290_v5  ;;  %v1316_v6 = vmul.f32 %v3072_v32, %v3293_v52  ;;  %v3723_v49 = vld [vmem:[#allocation2 + $0x150] sm:$0xff] }
 0x104   : > { %v1484_v2 = vmul.f32 %v3250_v47, %v1445_v41  ;;  %v1046_v55 = vadd.f32 %v1014_v27, %v946_v36  ;;  %v1415_v38 = vmul.f32 %v3646_v60, %v3685_v42  ;;  %v1485_v61 = vmul.f32 %v3250_v47, %v1446_v57 }
 0x105   : > { %v1047_v16 = vadd.f32 %v1015_v9, %v947_v13  ;;  %v1416_v17 = vmul.f32 %v3646_v60, %v3690_v33  ;;  %v616_v56 = vmul.f32 %v3625_v19, %v3056_v20  ;;  %v617_v8 = vmul.f32 %v3627_v40, %v3056_v20  ;;  %v3725_v9 = vld [vmem:[#allocation2 + $0x158] sm:$0xff] }
 0x106   : > { %v1523_v62 = vadd.f32 %v3259_v22, %v1484_v2  ;;  %v1146_v3 = vadd.f32 %v1114_v1, %v1046_v55  ;;  %v716_v48 = vmul.f32 %v3058_v23, %v3277_v63  ;;  %v1524_v39 = vadd.f32 %v3259_v22, %v1485_v61  ;;  %v3741_v2 = vld [vmem:[#allocation2 + $0x152] sm:$0xff]  ;;  %v3743_v55 = vld [vmem:[#allocation2 + $0x15a] sm:$0xff] }
 0x107   : > { %v1147_v15 = vadd.f32 %v1115_v21, %v1047_v16  ;;  %v717_v47 = vmul.f32 %v3058_v23, %v3280_v0  ;;  %v816_v50 = vmul.f32 %v3637_v7, %v3060_v25  ;;  %v817_v45 = vmul.f32 %v3641_v34, %v3060_v25 }
 0x108   : > { %v1555_v28 = vmax.f32 %v1523_v62, 0.0  ;;  %v1247_v19 = vadd.f32 %v1215_v18, %v1146_v3  ;;  %v748_v46 = vadd.f32 %v716_v48, %v616_v56  ;;  %v1556_v43 = vmax.f32 %v1524_v39, 0.0  ;;  %v3734_v18 = vld [vmem:[%s4355_s2] ss:$0 sm:$0xff] }
 0x109   : > { %v1248_v40 = vadd.f32 %v1216_v4, %v1147_v15  ;;  %v749_v10 = vadd.f32 %v717_v47, %v617_v8  ;;  %v916_v63 = vmul.f32 %v3673_v54, %v3062_v26  ;;  %v917_v0 = vmul.f32 %v3677_v58, %v3062_v26 }
 0x10a   : > { %v1347_v22 = vadd.f32 %v1315_v37, %v1247_v19  ;;  %v848_v11 = vadd.f32 %v816_v50, %v748_v46  ;;  %v1016_v7 = vmul.f32 %v3066_v29, %v3290_v5  ;;  %v1577_v51 = vpack.c.bf16 %v1556_v43, %v1555_v28 }
 0x10b   : > { %v1348_v35 = vadd.f32 %v1316_v6, %v1248_v40  ;;  %v849_v12 = vadd.f32 %v817_v45, %v749_v10  ;;  %v1017_v34 = vmul.f32 %v3066_v29, %v3293_v52  ;;  %v1116_v27 = vmul.f32 %v3685_v42, %v3068_v30 }
 0x10c   : > { %v1447_v44 = vadd.f32 %v1415_v38, %v1347_v22  ;;  %v948_v53 = vadd.f32 %v916_v63, %v848_v11  ;;  %v1117_v24 = vmul.f32 %v3690_v33, %v3068_v30  ;;  %2478 = vmatprep.mubr.bf16.mxu1 %v1577_v51  ;;  %v1217_v36 = vmul.f32 %v3070_v31, %v3723_v49 }
 0x10d   : > { %v1448_v1 = vadd.f32 %v1416_v17, %v1348_v35  ;;  %v949_v41 = vadd.f32 %v917_v0, %v849_v12  ;;  %v1218_v21 = vmul.f32 %v3070_v31, %v3725_v9  ;;  %v1317_v4 = vmul.f32 %v3072_v32, %v3296_v59  ;;  %v3753_v17 = vld [vmem:[%s4356_s3] ss:$0 sm:$0xff]  ;;  %v3781_v35 = vld [vmem:[#allocation2 + $0x168] sm:$0xff] }
 0x10e   : > { %v1486_v57 = vmul.f32 %v3734_v18, %v1447_v44  ;;  %v1048_v13 = vadd.f32 %v1016_v7, %v948_v53  ;;  %v1318_v37 = vmul.f32 %v3072_v32, %v3305_v14  ;;  %v1417_v61 = vmul.f32 %v3646_v60, %v3741_v2  ;;  %v3783_v44 = vld [vmem:[#allocation2 + $0x170] sm:$0xff] }
 0x10f   : > { %v1487_v6 = vmul.f32 %v3734_v18, %v1448_v1  ;;  %v1049_v38 = vadd.f32 %v1017_v34, %v949_v41  ;;  %v1418_v16 = vmul.f32 %v3646_v60, %v3743_v55  ;;  %v618_v3 = vmul.f32 %v3673_v54, %v3056_v20  ;;  %v3794_v41 = vld [vmem:[#allocation2 + $0x171] sm:$0xff] }
 0x110   : > { %v1525_v56 = vadd.f32 %v3753_v17, %v1486_v57  ;;  %v1148_v62 = vadd.f32 %v1116_v27, %v1048_v13  ;;  %v619_v8 = vmul.f32 %v3677_v58, %v3056_v20  ;;  %v718_v15 = vmul.f32 %v3058_v23, %v3290_v5 }
 0x111   : > { %v1526_v48 = vadd.f32 %v3753_v17, %v1487_v6  ;;  %v1149_v39 = vadd.f32 %v1117_v24, %v1049_v38  ;;  %v719_v47 = vmul.f32 %v3058_v23, %v3293_v52  ;;  %v818_v19 = vmul.f32 %v3685_v42, %v3060_v25  ;;  %v3790_v24 = vld [vmem:[#allocation2 + $0x169] sm:$0xff] }
 0x112   : > { %v1557_v50 = vmax.f32 %v1525_v56, 0.0  ;;  %v1249_v28 = vadd.f32 %v1217_v36, %v1148_v62  ;;  %v819_v54 = vmul.f32 %v3690_v33, %v3060_v25  ;;  %v750_v58 = vadd.f32 %v718_v15, %v618_v3 }
 0x113   : > { %v1558_v46 = vmax.f32 %v1526_v48, 0.0  ;;  %v1250_v45 = vadd.f32 %v1218_v21, %v1149_v39  ;;  %v751_v43 = vadd.f32 %v719_v47, %v619_v8  ;;  %v918_v10 = vmul.f32 %v3723_v49, %v3062_v26  ;;  %v3798_v21 = vld [vmem:[#allocation2 + $0x16a] sm:$0xff]  ;;  %v2601_v47 = vld [vmem:[#allocation2 + $0x159] sm:$0xff] }
 0x114   : > { %v1349_v40 = vadd.f32 %v1317_v4, %v1249_v28  ;;  %v919_v5 = vmul.f32 %v3725_v9, %v3062_v26  ;;  %v1018_v52 = vmul.f32 %v3066_v29, %v3296_v59  ;;  %v850_v42 = vadd.f32 %v818_v19, %v750_v58  ;;  %v2600_v48 = vld [vmem:[#allocation2 + $0x151] sm:$0xff] }
 0x115   : > { %v1578_v63 = vpack.c.bf16 %v1558_v46, %v1557_v50  ;;  %v1350_v22 = vadd.f32 %v1318_v37, %v1250_v45  ;;  %v851_v11 = vadd.f32 %v819_v54, %v751_v43  ;;  %v1019_v33 = vmul.f32 %v3066_v29, %v3305_v14  ;;  %v1384_v37 = vld [vmem:[#allocation2 + $0x172] sm:$0xff] }
 0x116   : > { %v1449_v0 = vadd.f32 %v1417_v61, %v1349_v40  ;;  %v1118_v7 = vmul.f32 %v3741_v2, %v3068_v30  ;;  %v1119_v51 = vmul.f32 %v3743_v55, %v3068_v30  ;;  %v950_v34 = vadd.f32 %v918_v10, %v850_v42 }
 0x117   : > { %2479 = vmatmul.mubr.bf16.gmra.mrb[4].mxu1 %v1578_v63  ;;  %v1450_v12 = vadd.f32 %v1418_v16, %v1350_v22  ;;  %v951_v59 = vadd.f32 %v919_v5, %v851_v11  ;;  %v1219_v53 = vmul.f32 %v3070_v31, %v3781_v35  ;;  %v1220_v14 = vmul.f32 %v3070_v31, %v3783_v44  ;;  %v1185_v11 = vld [vmem:[#allocation2 + $0x180] sm:$0xff] }
 0x118   : > { %v1488_v27 = vmul.f32 %v3734_v18, %v1449_v0  ;;  %v1319_v1 = vmul.f32 %v3790_v24, %v3072_v32  ;;  %v1320_v36 = vmul.f32 %v3794_v41, %v3072_v32  ;;  %v1050_v13 = vadd.f32 %v1018_v52, %v950_v34 }
 0x119   : > { %v1489_v57 = vmul.f32 %v3734_v18, %v1450_v12  ;;  %v1051_v4 = vadd.f32 %v1019_v33, %v951_v59  ;;  %v1419_v6 = vmul.f32 %v3646_v60, %v3798_v21  ;;  %v1420_v61 = vmul.f32 %v3646_v60, %v1384_v37 }
 0x11a   : > { %v1527_v38 = vadd.f32 %v3753_v17, %v1488_v27  ;;  %v620_v16 = vmul.f32 %v3723_v49, %v3056_v20  ;;  %v621_v56 = vmul.f32 %v3725_v9, %v3056_v20  ;;  %v1150_v3 = vadd.f32 %v1118_v7, %v1050_v13 }
 0x11b   : > { %v1528_v62 = vadd.f32 %v3753_v17, %v1489_v57  ;;  %v1151_v8 = vadd.f32 %v1119_v51, %v1051_v4  ;;  %v720_v39 = vmul.f32 %v2600_v48, %v3058_v23  ;;  %v721_v50 = vmul.f32 %v2601_v47, %v3058_v23  ;;  %v1186_v51 = vld [vmem:[#allocation2 + $0x188] sm:$0xff] }
 0x11c   : > { %v1559_v15 = vmax.f32 %v1527_v38, 0.0  ;;  %v820_v28 = vmul.f32 %v3741_v2, %v3060_v25  ;;  %v821_v49 = vmul.f32 %v3743_v55, %v3060_v25  ;;  %v1251_v54 = vadd.f32 %v1219_v53, %v1150_v3  ;;  %v2602_v53 = vld [vmem:[#allocation2 + $0x181] sm:$0xff] }
 0x11d   : > { %v1560_v19 = vmax.f32 %v1528_v62, 0.0  ;;  %v1252_v9 = vadd.f32 %v1220_v14, %v1151_v8  ;;  %v752_v46 = vadd.f32 %v720_v39, %v620_v16  ;;  %v753_v45 = vadd.f32 %v721_v50, %v621_v56  ;;  %v2603_v14 = vld [vmem:[#allocation2 + $0x189] sm:$0xff] }
 0x11e   : > { %v920_v58 = vmul.f32 %v3781_v35, %v3062_v26  ;;  %v921_v43 = vmul.f32 %v3783_v44, %v3062_v26  ;;  %v1020_v40 = vmul.f32 %v3790_v24, %v3066_v29  ;;  %v1351_v5 = vadd.f32 %v1319_v1, %v1251_v54 }
 0x11f   : > { %v1579_v10 = vpack.c.bf16 %v1560_v19, %v1559_v15  ;;  %v1352_v2 = vadd.f32 %v1320_v36, %v1252_v9  ;;  %v852_v52 = vadd.f32 %v820_v28, %v752_v46  ;;  %v853_v63 = vadd.f32 %v821_v49, %v753_v45  ;;  %v1385_v36 = vld [vmem:[#allocation2 + $0x182] sm:$0xff] }
 0x120   : > { %v1021_v55 = vmul.f32 %v3794_v41, %v3066_v29  ;;  %v1120_v22 = vmul.f32 %v3798_v21, %v3068_v30  ;;  %v1121_v42 = vmul.f32 %v1384_v37, %v3068_v30  ;;  %v1451_v0 = vadd.f32 %v1419_v6, %v1351_v5  ;;  %v1386_v6 = vld [vmem:[#allocation2 + $0x18a] sm:$0xff] }
 0x121   : > { %2482 = vmatprep.mubr.bf16.mxu1 %v1579_v10  ;;  %v1452_v33 = vadd.f32 %v1420_v61, %v1352_v2  ;;  %v952_v7 = vadd.f32 %v920_v58, %v852_v52  ;;  %v1221_v12 = vmul.f32 %v3070_v31, %v1185_v11  ;;  %v953_v34 = vadd.f32 %v921_v43, %v853_v63  ;;  %v1287_v52 = vld [vmem:[#allocation2 + $0x199] sm:$0xff] }
 0x122   : > { %v1222_v59 = vmul.f32 %v3070_v31, %v1186_v51  ;;  %v1321_v27 = vmul.f32 %v2602_v53, %v3072_v32  ;;  %v1322_v1 = vmul.f32 %v2603_v14, %v3072_v32  ;;  %v1490_v57 = vmul.f32 %v3734_v18, %v1451_v0  ;;  %v1387_v0 = vld [vmem:[#allocation2 + $0x19a] sm:$0xff] }
 0x123   : > { %v1491_v13 = vmul.f32 %v3734_v18, %v1452_v33  ;;  %v1052_v4 = vadd.f32 %v1020_v40, %v952_v7  ;;  %v1421_v38 = vmul.f32 %v3646_v60, %v1385_v36  ;;  %v1053_v61 = vadd.f32 %v1021_v55, %v953_v34  ;;  %v2604_v55 = vld [vmem:[#allocation2] sm:$0xff] }
 0x124   : > { %v1422_v16 = vmul.f32 %v3646_v60, %v1386_v6  ;;  %v622_v56 = vmul.f32 %v3781_v35, %v3056_v20  ;;  %v623_v62 = vmul.f32 %v3783_v44, %v3056_v20  ;;  %v1529_v3 = vadd.f32 %v3753_v17, %v1490_v57 }
 0x125   : > { %v1530_v8 = vadd.f32 %v3753_v17, %v1491_v13  ;;  %v1152_v48 = vadd.f32 %v1120_v22, %v1052_v4  ;;  %v722_v39 = vmul.f32 %v3790_v24, %v3058_v23  ;;  %v1153_v15 = vadd.f32 %v1121_v42, %v1053_v61  ;;  %v1288_v42 = vld [vmem:[#allocation2 + $0x1a1] sm:$0xff] }
 0x126   : > { %v723_v47 = vmul.f32 %v3794_v41, %v3058_v23  ;;  %v822_v50 = vmul.f32 %v3798_v21, %v3060_v25  ;;  %v823_v35 = vmul.f32 %v1384_v37, %v3060_v25  ;;  %v1561_v28 = vmax.f32 %v1529_v3, 0.0 }
 0x127   : > { %v1562_v49 = vmax.f32 %v1530_v8, 0.0  ;;  %v1253_v20 = vadd.f32 %v1221_v12, %v1152_v48  ;;  %v754_v44 = vadd.f32 %v722_v39, %v622_v56  ;;  %v1254_v19 = vadd.f32 %v1222_v59, %v1153_v15  ;;  %v1388_v12 = vld [vmem:[#allocation2 + $0x1a2] sm:$0xff] }
 0x128   : > { %v755_v54 = vadd.f32 %v723_v47, %v623_v62  ;;  %v922_v9 = vmul.f32 %v1185_v11, %v3062_v26  ;;  %v923_v46 = vmul.f32 %v1186_v51, %v3062_v26  ;;  %v1022_v23 = vmul.f32 %v2602_v53, %v3066_v29 }
 0x129   : > { %v1580_v24 = vpack.c.bf16 %v1562_v49, %v1561_v28  ;;  %v1353_v45 = vadd.f32 %v1321_v27, %v1253_v20  ;;  %v854_v58 = vadd.f32 %v822_v50, %v754_v44  ;;  %v1354_v41 = vadd.f32 %v1322_v1, %v1254_v19  ;;  %v3877_v20 = vld [vmem:[%s4359_s6] ss:$0 sm:$0xff] }
 0x12a   : > { %v855_v43 = vadd.f32 %v823_v35, %v755_v54  ;;  %v1023_v21 = vmul.f32 %v2603_v14, %v3066_v29  ;;  %v1122_v40 = vmul.f32 %v1385_v36, %v3068_v30  ;;  %v1123_v2 = vmul.f32 %v1386_v6, %v3068_v30 }
 0x12b   : > { %2483 = vmatmul.mubr.bf16.gmra.mrb[8].mxu1 %v1580_v24  ;;  %v1453_v25 = vadd.f32 %v1421_v38, %v1353_v45  ;;  %v954_v37 = vadd.f32 %v922_v9, %v854_v58  ;;  %v1454_v10 = vadd.f32 %v1422_v16, %v1354_v41  ;;  %v1223_v22 = vmul.f32 %v2604_v55, %v3070_v31 }
 0x12c   : > { %v955_v5 = vadd.f32 %v923_v46, %v855_v43  ;;  %v1323_v51 = vmul.f32 %v3072_v32, %v1287_v52  ;;  %v1324_v59 = vmul.f32 %v3072_v32, %v1288_v42  ;;  %v1423_v31 = vmul.f32 %v3646_v60, %v1387_v0 }
 0x12d   : > { %v1492_v26 = vmul.f32 %v3734_v18, %v1453_v25  ;;  %v1054_v63 = vadd.f32 %v1022_v23, %v954_v37  ;;  %v1493_v11 = vmul.f32 %v3734_v18, %v1454_v10  ;;  %v1424_v36 = vmul.f32 %v3646_v60, %v1388_v12 }
 0x12e   : > { %v1055_v29 = vadd.f32 %v1023_v21, %v955_v5 }
 0x12f   : > { %v1531_v33 = vadd.f32 %v3753_v17, %v1492_v26  ;;  %v1154_v7 = vadd.f32 %v1122_v40, %v1054_v63  ;;  %v1532_v30 = vadd.f32 %v3753_v17, %v1493_v11 }
 0x130   : > { %v1155_v34 = vadd.f32 %v1123_v2, %v1055_v29 }
 0x131   : > { %v1563_v53 = vmax.f32 %v1531_v33, 0.0  ;;  %v1255_v27 = vadd.f32 %v1223_v22, %v1154_v7  ;;  %v1564_v14 = vmax.f32 %v1532_v30, 0.0 }
 0x132   : > { %v1256_v1 = vadd.f32 %v1223_v22, %v1155_v34 }
 0x133   : > { %v1355_v57 = vadd.f32 %v1323_v51, %v1255_v27  ;;  %v1581_v13 = vpack.c.bf16 %v1564_v14, %v1563_v53 }
 0x134   : > { %v1356_v4 = vadd.f32 %v1324_v59, %v1256_v1 }
 0x135   : > { %v1455_v6 = vadd.f32 %v1423_v31, %v1355_v57  ;;  %2486 = vmatprep.mubr.bf16.mxu1 %v1581_v13 }
 0x136   : > { %v1456_v38 = vadd.f32 %v1424_v36, %v1356_v4 }
 0x137   : > { %v1494_v61 = vmul.f32 %v3734_v18, %v1455_v6 }
 0x138   : > { %v1495_v16 = vmul.f32 %v3734_v18, %v1456_v38  ;;  %v3870_v18 = vld [vmem:[%s4358_s5] ss:$0 sm:$0xff] }
 0x139   : > { %v1533_v32 = vadd.f32 %v3753_v17, %v1494_v61 }
 0x13a   : > { %v1534_v56 = vadd.f32 %v3753_v17, %v1495_v16 }
 0x13b   : > { %v1565_v62 = vmax.f32 %v1533_v32, 0.0 }
 0x13c   : > { %v1566_v3 = vmax.f32 %v1534_v56, 0.0 }
 0x13e   : > { %v1582_v8 = vpack.c.bf16 %v1566_v3, %v1565_v62 }
 0x140   : > { %2487 = vmatmul.mubr.bf16.gmra.mrb[12].mxu1 %v1582_v8 }
 0x183   : > { %v2460_v48 = vpop.f32.mrb[0].mxu0 }
 0x184   : > { %v1681_v60 = vpop.f32.mrb[1].mxu0  ;;  %v1817_v19 = vmul.f32 %v2460_v48, %v3870_v18 }
 0x185   : > { %v2461_v39 = vpop.f32.mrb[2].mxu0  ;;  %v1815_v17 = vmul.f32 %v3870_v18, %v1681_v60 }
 0x186   : > { %v1684_v15 = vpop.f32.mrb[3].mxu0  ;;  %v3888_v45 = vadd.f32 %v3877_v20, %v1817_v19  ;;  %v1818_v23 = vmul.f32 %v2461_v39, %v3870_v18 }
 0x187   : > { %v1816_v49 = vmul.f32 %v3870_v18, %v1684_v15  ;;  %v3884_v54 = vadd.f32 %v3877_v20, %v1815_v17 }
 0x188   : > { %v1888_v37 = vmax.f32 %v3888_v45, 0.0  ;;  %v3899_v40 = vadd.f32 %v3877_v20, %v1818_v23 }
 0x189   : > { %v3880_v44 = vadd.f32 %v3877_v20, %v1816_v49  ;;  %v1886_v58 = vmax.f32 %v3884_v54, 0.0 }
 0x18a   : > { %v1889_v52 = vmax.f32 %v3899_v40, 0.0 }
 0x18b   : > { %v1887_v9 = vmax.f32 %v3880_v44, 0.0 }
 0x18d   : > { %v1918_v21 = vadd.f32 %v1887_v9, %v1886_v58 }
 0x18f   : > { %v1919_v10 = vadd.f32 %v1918_v21, %v1888_v37 }
 0x191   : > { %v1920_v63 = vadd.f32 %v1919_v10, %v1889_v52 }
 0x199   : > { %v2464_v47 = vpop.f32.mrb[4].mxu0 }
 0x19a   : > { %v1697_v50 = vpop.f32.mrb[5].mxu0  ;;  %v1821_v22 = vmul.f32 %v2464_v47, %v3870_v18 }
 0x19b   : > { %v2465_v35 = vpop.f32.mrb[6].mxu0  ;;  %v1819_v25 = vmul.f32 %v3870_v18, %v1697_v50 }
 0x19c   : > { %v1700_v28 = vpop.f32.mrb[7].mxu0  ;;  %v3919_v29 = vadd.f32 %v3877_v20, %v1821_v22  ;;  %v1822_v0 = vmul.f32 %v2465_v35, %v3870_v18 }
 0x19d   : > { %v3904_v5 = vadd.f32 %v3877_v20, %v1819_v25  ;;  %v1820_v2 = vmul.f32 %v3870_v18, %v1700_v28 }
 0x19e   : > { %v4406_v51 = vmax.f32 %v3919_v29, 0.0  ;;  %v3927_v12 = vadd.f32 %v3877_v20, %v1822_v0 }
 0x19f   : > { %v4408_v26 = vmax.f32 %v3904_v5, 0.0  ;;  %v3912_v55 = vadd.f32 %v3877_v20, %v1820_v2 }
 0x1a0   : > { %v4405_v1 = vmax.f32 %v3927_v12, 0.0  ;;  %v4436_v54 = vmax.f32 %v3927_v12, 0.0 }
 0x1a1   : > { %v1921_v42 = vadd.f32 %v1920_v63, %v4408_v26  ;;  %v4407_v11 = vmax.f32 %v3912_v55, 0.0 }
 0x1a3   : > { %v1922_v33 = vadd.f32 %v1921_v42, %v4407_v11 }
 0x1a5   : > { %v1923_v59 = vadd.f32 %v1922_v33, %v4406_v51 }
 0x1a7   : > { %v1924_v57 = vadd.f32 %v1923_v59, %v4405_v1  ;;  %v2076_v1 = vld [vmem:[#allocation8 + $0x38] sm:$0xff] }
 0x1ab   : > { %v2468_v46 = vpop.f32.mrb[8].mxu0 }
 0x1ac   : > { %v1713_v24 = vpop.f32.mrb[9].mxu0  ;;  %v1825_v4 = vmul.f32 %v2468_v46, %v3870_v18 }
 0x1ad   : > { %v2469_v41 = vpop.f32.mrb[10].mxu0  ;;  %v1823_v7 = vmul.f32 %v3870_v18, %v1713_v24 }
 0x1ae   : > { %v1716_v43 = vpop.f32.mrb[11].mxu0  ;;  %v3947_v61 = vadd.f32 %v3877_v20, %v1825_v4  ;;  %v1826_v16 = vmul.f32 %v2469_v41, %v3870_v18 }
 0x1af   : > { %v3932_v53 = vadd.f32 %v3877_v20, %v1823_v7  ;;  %v1824_v27 = vmul.f32 %v3870_v18, %v1716_v43 }
 0x1b0   : > { %v4402_v62 = vmax.f32 %v3947_v61, 0.0  ;;  %v3955_v3 = vadd.f32 %v3877_v20, %v1826_v16  ;;  %v4439_v40 = vmax.f32 %v3947_v61, 0.0 }
 0x1b1   : > { %v4404_v36 = vmax.f32 %v3932_v53, 0.0  ;;  %v3940_v13 = vadd.f32 %v3877_v20, %v1824_v27  ;;  %v4437_v44 = vmax.f32 %v3932_v53, 0.0 }
 0x1b2   : > { %v4401_v39 = vmax.f32 %v3955_v3, 0.0 }
 0x1b3   : > { %v1925_v6 = vadd.f32 %v1924_v57, %v4404_v36  ;;  %v4403_v38 = vmax.f32 %v3940_v13, 0.0  ;;  %v4438_v45 = vmax.f32 %v3940_v13, 0.0 }
 0x1b5   : > { %v1926_v32 = vadd.f32 %v1925_v6, %v4403_v38 }
 0x1b7   : > { %v1927_v8 = vadd.f32 %v1926_v32, %v4402_v62 }
 0x1b9   : > { %v1928_v35 = vadd.f32 %v1927_v8, %v4401_v39 }
 0x1c1   : > { %v2472_v30 = vpop.f32.mrb[12].mxu0 }
 0x1c2   : > { %v1729_v34 = vpop.f32.mrb[13].mxu0  ;;  %v1829_v19 = vmul.f32 %v2472_v30, %v3870_v18 }
 0x1c3   : > { %v2473_v31 = vpop.f32.mrb[14].mxu0  ;;  %v1827_v56 = vmul.f32 %v3870_v18, %v1729_v34 }
 0x1c4   : > { %v1732_v14 = vpop.f32.mrb[15].mxu0  ;;  %v3975_v23 = vadd.f32 %v3877_v20, %v1829_v19  ;;  %v1830_v41 = vmul.f32 %v2473_v31, %v3870_v18 }
 0x1c5   : > { %v3960_v48 = vadd.f32 %v3877_v20, %v1827_v56  ;;  %v1828_v60 = vmul.f32 %v3870_v18, %v1732_v14 }
 0x1c6   : > { %v4398_v25 = vmax.f32 %v3975_v23, 0.0  ;;  %v3983_v10 = vadd.f32 %v3877_v20, %v1830_v41  ;;  %v4443_v61 = vmax.f32 %v3975_v23, 0.0 }
 0x1c7   : > { %v4400_v50 = vmax.f32 %v3960_v48, 0.0  ;;  %v3968_v28 = vadd.f32 %v3877_v20, %v1828_v60 }
 0x1c8   : > { %v4397_v22 = vmax.f32 %v3983_v10, 0.0 }
 0x1c9   : > { %v1929_v46 = vadd.f32 %v1928_v35, %v4400_v50  ;;  %v4399_v24 = vmax.f32 %v3968_v28, 0.0  ;;  %v2073_v50 = vld [vmem:[#allocation8 + $0x20] sm:$0xff]  ;;  %v4442_v53 = vmax.f32 %v3968_v28, 0.0 }
 0x1cb   : > { %v1930_v43 = vadd.f32 %v1929_v46, %v4399_v24 }
 0x1cd   : > { %v1931_v2 = vadd.f32 %v1930_v43, %v4398_v25 }
 0x1cf   : > { %v1932_v33 = vadd.f32 %v1931_v2, %v4397_v22 }
 0x1d5   : > { %v2476_v15 = vpop.f32.mrb[0].mxu1 }
 0x1d6   : > { %v1745_v47 = vpop.f32.mrb[1].mxu1  ;;  %v1833_v7 = vmul.f32 %v2476_v15, %v3870_v18 }
 0x1d7   : > { %v2477_v49 = vpop.f32.mrb[2].mxu1  ;;  %v1831_v21 = vmul.f32 %v3870_v18, %v1745_v47 }
 0x1d8   : > { %v1748_v17 = vpop.f32.mrb[3].mxu1  ;;  %v4002_v14 = vadd.f32 %v3877_v20, %v1833_v7  ;;  %v1834_v57 = vmul.f32 %v2477_v49, %v3870_v18 }
 0x1d9   : > { %v3988_v63 = vadd.f32 %v3877_v20, %v1831_v21  ;;  %v1832_v42 = vmul.f32 %v3870_v18, %v1748_v17 }
 0x1da   : > { %v4391_v56 = vmax.f32 %v4002_v14, 0.0  ;;  %v4011_v8 = vadd.f32 %v3877_v20, %v1834_v57 }
 0x1db   : > { %v4396_v0 = vmax.f32 %v3988_v63, 0.0  ;;  %v3997_v30 = vadd.f32 %v3877_v20, %v1832_v42 }
 0x1dc   : > { %v4390_v47 = vmax.f32 %v4011_v8, 0.0 }
 0x1dd   : > { %v1933_v59 = vadd.f32 %v1932_v33, %v4396_v0  ;;  %v4393_v4 = vmax.f32 %v3997_v30, 0.0  ;;  %v4446_v23 = vmax.f32 %v3997_v30, 0.0 }
 0x1df   : > { %v1934_v16 = vadd.f32 %v1933_v59, %v4393_v4 }
 0x1e1   : > { %v1935_v60 = vadd.f32 %v1934_v16, %v4391_v56  ;;  %v1959_v56 = vld [vmem:[%s4360_s7 + $0x10] sm:$0xff] }
 0x1e3   : > { %v1936_v17 = vadd.f32 %v1935_v60, %v4390_v47 }
 0x1ea   : > { %v2480_v34 = vpop.f32.mrb[4].mxu1 }
 0x1eb   : > { %v1761_v27 = vpop.f32.mrb[5].mxu1  ;;  %v1837_v19 = vmul.f32 %v2480_v34, %v3870_v18 }
 0x1ec   : > { %v2481_v31 = vpop.f32.mrb[6].mxu1  ;;  %v1835_v32 = vmul.f32 %v3870_v18, %v1761_v27 }
 0x1ed   : > { %v1764_v6 = vpop.f32.mrb[7].mxu1  ;;  %v4030_v43 = vadd.f32 %v3877_v20, %v1837_v19  ;;  %v1838_v21 = vmul.f32 %v2481_v31, %v3870_v18 }
 0x1ee   : > { %v4016_v15 = vadd.f32 %v3877_v20, %v1835_v32  ;;  %v1836_v35 = vmul.f32 %v3870_v18, %v1764_v6 }
 0x1ef   : > { %v4383_v27 = vmax.f32 %v4030_v43, 0.0  ;;  %v4039_v57 = vadd.f32 %v3877_v20, %v1838_v21 }
 0x1f0   : > { %v4387_v49 = vmax.f32 %v4016_v15, 0.0  ;;  %v4025_v46 = vadd.f32 %v3877_v20, %v1836_v35 }
 0x1f1   : > { %v4381_v32 = vmax.f32 %v4039_v57, 0.0 }
 0x1f2   : > { %v1937_v41 = vadd.f32 %v1936_v17, %v4387_v49  ;;  %v4384_v2 = vmax.f32 %v4025_v46, 0.0  ;;  %v4450_v30 = vmax.f32 %v4025_v46, 0.0 }
 0x1f4   : > { %v1938_v33 = vadd.f32 %v1937_v41, %v4384_v2 }
 0x1f6   : > { %v1939_v16 = vadd.f32 %v1938_v33, %v4383_v27 }
 0x1f8   : > { %v1940_v17 = vadd.f32 %v1939_v16, %v4381_v32 }
 0x1fe   : > { %v2484_v42 = vpop.f32.mrb[8].mxu1 }
 0x1ff   : > { %v1777_v7 = vpop.f32.mrb[9].mxu1  ;;  %v1841_v19 = vmul.f32 %v2484_v42, %v3870_v18 }
 0x200   : > { %v1839_v34 = vmul.f32 %v3870_v18, %v1777_v7  ;;  %v2485_v59 = vpop.f32.mrb[10].mxu1 }
 0x201   : > { %v1780_v6 = vpop.f32.mrb[11].mxu1  ;;  %v4058_v33 = vadd.f32 %v3877_v20, %v1841_v19  ;;  %v1842_v7 = vmul.f32 %v2485_v59, %v3870_v18 }
 0x202   : > { %v4044_v31 = vadd.f32 %v3877_v20, %v1839_v34  ;;  %v1840_v60 = vmul.f32 %v3870_v18, %v1780_v6 }
 0x203   : > { %v4386_v16 = vmax.f32 %v4058_v33, 0.0  ;;  %v4066_v42 = vadd.f32 %v3877_v20, %v1842_v7 }
 0x204   : > { %v4382_v35 = vmax.f32 %v4044_v31, 0.0  ;;  %v4053_v41 = vadd.f32 %v3877_v20, %v1840_v60 }
 0x205   : > { %v4388_v19 = vmax.f32 %v4066_v42, 0.0 }
 0x206   : > { %v1941_v21 = vadd.f32 %v1940_v17, %v4382_v35  ;;  %v4385_v34 = vmax.f32 %v4053_v41, 0.0 }
 0x208   : > { %v1942_v6 = vadd.f32 %v1941_v21, %v4385_v34 }
 0x20a   : > { %v1943_v60 = vadd.f32 %v1942_v6, %v4386_v16 }
 0x20c   : > { %v1944_v7 = vadd.f32 %v1943_v60, %v4388_v19 }
 0x213   : > { %v2488_v32 = vpop.f32.mrb[12].mxu1 }
 0x214   : > { %v1793_v17 = vpop.f32.mrb[13].mxu1  ;;  %v1845_v35 = vmul.f32 %v2488_v32, %v3870_v18 }
 0x215   : > { %v1843_v59 = vmul.f32 %v3870_v18, %v1793_v17  ;;  %v2489_v27 = vpop.f32.mrb[14].mxu1 }
 0x216   : > { %v1796_v2 = vpop.f32.mrb[15].mxu1  ;;  %v1846_v34 = vmul.f32 %v2489_v27, %v3870_v18  ;;  %v4081_v16 = vadd.f32 %v3877_v20, %v1845_v35 }
 0x217   : > { %v4074_v21 = vadd.f32 %v3877_v20, %v1843_v59  ;;  %v1844_v6 = vmul.f32 %v3870_v18, %v1796_v2 }
 0x218   : > { %v4090_v59 = vadd.f32 %v3877_v20, %v1846_v34  ;;  %v4395_v27 = vmax.f32 %v4081_v16, 0.0 }
 0x219   : > { %v4389_v49 = vmax.f32 %v4074_v21, 0.0  ;;  %v4085_v32 = vadd.f32 %v3877_v20, %v1844_v6 }
 0x21a   : > { %v4394_v2 = vmax.f32 %v4090_v59, 0.0 }
 0x21b   : > { %v1945_v17 = vadd.f32 %v1944_v7, %v4389_v49  ;;  %v4392_v60 = vmax.f32 %v4085_v32, 0.0 }
 0x21d   : > { %v1946_v18 = vadd.f32 %v1945_v17, %v4392_v60  ;;  %v1957_v17 = vld [vmem:[%s4360_s7] sm:$0xff] }
 0x21f   : > { %v1947_v35 = vadd.f32 %v1946_v18, %v4395_v27 }
 0x221   : > { %v1948_v6 = vadd.f32 %v1947_v35, %v4394_v2  ;;  %v1960_v35 = vld [vmem:[%s4360_s7 + $0x18] sm:$0xff] }
 0x223   : > { %v1949_v19 = vrot.slane %v1948_v6, 4 }
 0x225   : > { %v1950_v7 = vadd.f32 %v1949_v19, %v1948_v6 }
 0x227   : > { %v1951_v49 = vrot.slane %v1950_v7, 2 }
 0x229   : > { %v1952_v20 = vadd.f32 %v1951_v49, %v1950_v7  ;;  %v1958_v49 = vld [vmem:[%s4360_s7 + $0x8] sm:$0xff] }
 0x22a   : > { %v1962_v7 = vld [vmem:[%s4360_s7 + $0x28] sm:$0xff] }
 0x22b   : > { %v1953_v34 = vrot.slane %v1952_v20, 1 }
 0x22d   : > { %v1954_v47 = vadd.f32 %v1953_v34, %v1952_v20  ;;  %v1964_v34 = vld [vmem:[%s4360_s7 + $0x38] sm:$0xff] }
 0x22f   : > { %v1956_v60 = vmul.f32 0.00390625, %v1954_v47 }
 0x231   : > { %v1975_v4 = vmul.f32 %v1959_v56, %v1956_v60  ;;  %v1973_v18 = vmul.f32 %v1957_v17, %v1956_v60  ;;  %v1976_v19 = vmul.f32 %v1960_v35, %v1956_v60  ;;  %v1974_v6 = vmul.f32 %v1958_v49, %v1956_v60  ;;  %v1961_v56 = vld [vmem:[%s4360_s7 + $0x20] sm:$0xff]  ;;  %v1966_v35 = vld [vmem:[%s4360_s7 + $0x48] sm:$0xff] }
 0x232   : > { %v1978_v47 = vmul.f32 %v1962_v7, %v1956_v60  ;;  %v1977_v20 = vmul.f32 %v1961_v56, %v1956_v60  ;;  %v1980_v17 = vmul.f32 %v1964_v34, %v1956_v60  ;;  %v1965_v49 = vld [vmem:[%s4360_s7 + $0x40] sm:$0xff]  ;;  %v1968_v7 = vld [vmem:[%s4360_s7 + $0x58] sm:$0xff]  ;;  %v1967_v56 = vld [vmem:[%s4360_s7 + $0x50] sm:$0xff] }
 0x233   : > { %1993 = vadd.xlane.f32.xlu1 %v1975_v4  ;;  %1989 = vadd.xlane.f32.xlu0 %v1973_v18  ;;  %v1963_v4 = vld [vmem:[%s4360_s7 + $0x30] sm:$0xff]  ;;  %v1983_v34 = vmul.f32 %v1967_v56, %v1956_v60  ;;  %v2021_v56 = vld [vmem:[%s4361_s8] sm:$0xff] }
 0x234   : > { %v1979_v18 = vmul.f32 %v1963_v4, %v1956_v60  ;;  %v1970_v4 = vld [vmem:[%s4360_s7 + $0x68] sm:$0xff] }
 0x237   : > { %1995 = vadd.xlane.f32.xlu1 %v1976_v19  ;;  %1991 = vadd.xlane.f32.xlu0 %v1974_v6  ;;  %v1982_v19 = vmul.f32 %v1966_v35, %v1956_v60  ;;  %v1981_v6 = vmul.f32 %v1965_v49, %v1956_v60  ;;  %v1972_v49 = vld [vmem:[%s4360_s7 + $0x78] sm:$0xff] }
 0x23b   : > { %1999 = vadd.xlane.f32.xlu1 %v1978_v47  ;;  %1997 = vadd.xlane.f32.xlu0 %v1977_v20  ;;  %v2771_v47 = vmov 0   ;;  %v1984_v20 = vmul.f32 %v1968_v7, %v1956_v60 }
 0x23c   : > { %2581 = vset.pattern.permute.xlu0 %v2771_v47  ;;  %2582 = vset.pattern.permute.xlu1 %v2771_v47 }
 0x23f   : > { %2003 = vadd.xlane.f32.xlu1 %v1980_v17  ;;  %2001 = vadd.xlane.f32.xlu0 %v1979_v18  ;;  %v1969_v17 = vld [vmem:[%s4360_s7 + $0x60] sm:$0xff]  ;;  %v1986_v18 = vmul.f32 %v1970_v4, %v1956_v60  ;;  %v2022_v4 = vld [vmem:[%s4361_s8 + $0x8] sm:$0xff] }
 0x240   : > { %v1985_v35 = vmul.f32 %v1969_v17, %v1956_v60 }
 0x243   : > { %2007 = vadd.xlane.f32.xlu1 %v1982_v19  ;;  %2005 = vadd.xlane.f32.xlu0 %v1981_v6  ;;  %v1971_v19 = vld [vmem:[%s4360_s7 + $0x70] sm:$0xff]  ;;  %v1988_v6 = vmul.f32 %v1972_v49, %v1956_v60 }
 0x244   : > { %v1987_v7 = vmul.f32 %v1971_v19, %v1956_v60 }
 0x247   : > { %2011 = vadd.xlane.f32.xlu1 %v1984_v20  ;;  %2009 = vadd.xlane.f32.xlu0 %v1983_v34 }
 0x24b   : > { %2015 = vadd.xlane.f32.xlu1 %v1986_v18  ;;  %2013 = vadd.xlane.f32.xlu0 %v1985_v35  ;;  %v2023_v18 = vld [vmem:[%s4361_s8 + $0x10] sm:$0xff] }
 0x24f   : > { %2019 = vadd.xlane.f32.xlu1 %v1988_v6  ;;  %2017 = vadd.xlane.f32.xlu0 %v1987_v7  ;;  %v2024_v7 = vld [vmem:[%s4361_s8 + $0x18] sm:$0xff] }
 0x2c0   : > { %v1994_v47 = vpop.xlane.xlu1 %1993  ;;  %v1990_v20 = vpop.xlane.xlu0 %1989 }
 0x2c1   : > { %v2037_v34 = vadd.f32 %v2021_v56, %v1990_v20  ;;  %v2039_v19 = vadd.f32 %v2023_v18, %v1994_v47  ;;  %v2030_v47 = vld [vmem:[%s4361_s8 + $0x48] sm:$0xff] }
 0x2c2   : > { %v2026_v18 = vld [vmem:[%s4361_s8 + $0x28] sm:$0xff] }
 0x2c3   : > { %v2053_v17 = vmax.f32 %v2037_v34, 0.0  ;;  %v2055_v2 = vmax.f32 %v2039_v19, 0.0  ;;  %v2025_v34 = vld [vmem:[%s4361_s8 + $0x20] sm:$0xff] }
 0x2c4   : > { %v1996_v35 = vpop.xlane.xlu1 %1995  ;;  %v1992_v60 = vpop.xlane.xlu0 %1991 }
 0x2c5   : > { %v2038_v49 = vadd.f32 %v2022_v4, %v1992_v60  ;;  %2087 = vperm.xlu0 %2581, %v2053_v17   ;;  %v2040_v27 = vadd.f32 %v2024_v7, %v1996_v35  ;;  %v2032_v35 = vld [vmem:[%s4361_s8 + $0x58] sm:$0xff] }
 0x2c7   : > { %v2054_v6 = vmax.f32 %v2038_v49, 0.0  ;;  %v2056_v4 = vmax.f32 %v2040_v27, 0.0  ;;  %v2027_v27 = vld [vmem:[%s4361_s8 + $0x30] sm:$0xff] }
 0x2c8   : > { %v2000_v56 = vpop.xlane.xlu1 %1999  ;;  %v1998_v20 = vpop.xlane.xlu0 %1997 }
 0x2c9   : > { %2092 = vperm.xlu1 %2582, %v2054_v6   ;;  %v2041_v17 = vadd.f32 %v2025_v34, %v1998_v20  ;;  %v2042_v6 = vadd.f32 %v2026_v18, %v2000_v56  ;;  %v2028_v56 = vld [vmem:[%s4361_s8 + $0x38] sm:$0xff] }
 0x2cc   : > { %v2004_v0 = vpop.xlane.xlu1 %2003  ;;  %v2002_v60 = vpop.xlane.xlu0 %2001 }
 0x2cd   : > { %2097 = vperm.xlu1 %2582, %v2055_v2   ;;  %v2057_v2 = vmax.f32 %v2041_v17, 0.0 }
 0x2d0   : > { %v2008_v49 = vpop.xlane.xlu1 %2007  ;;  %v2006_v22 = vpop.xlane.xlu0 %2005 }
 0x2d1   : > { %v2046_v19 = vadd.f32 %v2030_v47, %v2008_v49  ;;  %2102 = vperm.xlu1 %2582, %v2056_v4   ;;  %v2034_v47 = vld [vmem:[%s4361_s8 + $0x68] sm:$0xff]  ;;  %v2058_v4 = vmax.f32 %v2042_v6, 0.0  ;;  %v2043_v49 = vadd.f32 %v2027_v27, %v2002_v60  ;;  %v2029_v60 = vld [vmem:[%s4361_s8 + $0x40] sm:$0xff] }
 0x2d3   : > { %v2062_v7 = vmax.f32 %v2046_v19, 0.0  ;;  %v2036_v19 = vld [vmem:[%s4361_s8 + $0x78] sm:$0xff] }
 0x2d4   : > { %v2012_v20 = vpop.xlane.xlu1 %2011  ;;  %v2010_v6 = vpop.xlane.xlu0 %2009 }
 0x2d5   : > { %v2048_v34 = vadd.f32 %v2032_v35, %v2012_v20  ;;  %2132 = vperm.xlu0 %2581, %v2062_v7   ;;  %2107 = vperm.xlu1 %2582, %v2057_v2   ;;  %v2044_v35 = vadd.f32 %v2028_v56, %v2004_v0  ;;  %v2059_v2 = vmax.f32 %v2043_v49, 0.0 }
 0x2d7   : > { %v2064_v25 = vmax.f32 %v2048_v34, 0.0  ;;  %v2060_v34 = vmax.f32 %v2044_v35, 0.0 }
 0x2d8   : > { %v2016_v17 = vpop.xlane.xlu1 %2015  ;;  %v2014_v0 = vpop.xlane.xlu0 %2013 }
 0x2d9   : > { %v2050_v18 = vadd.f32 %v2034_v47, %v2016_v17  ;;  %2142 = vperm.xlu0 %2581, %v2064_v25   ;;  %2112 = vperm.xlu1 %2582, %v2058_v4   ;;  %v2045_v47 = vadd.f32 %v2029_v60, %v2006_v22  ;;  %v2031_v4 = vld [vmem:[%s4361_s8 + $0x50] sm:$0xff]  ;;  %v2033_v17 = vld [vmem:[%s4361_s8 + $0x60] sm:$0xff] }
 0x2da   : > { %v2047_v56 = vadd.f32 %v2031_v4, %v2010_v6  ;;  %v2035_v22 = vld [vmem:[%s4361_s8 + $0x70] sm:$0xff]  ;;  %v2071_v4 = vld [vmem:[#allocation8 + $0x10] sm:$0xff] }
 0x2db   : > { %v2066_v7 = vmax.f32 %v2050_v18, 0.0  ;;  %v2061_v49 = vmax.f32 %v2045_v47, 0.0  ;;  %v2069_v47 = vld [vmem:[#allocation8] sm:$0xff] }
 0x2dc   : > { %v2020_v27 = vpop.xlane.xlu1 %2019  ;;  %v2063_v18 = vmax.f32 %v2047_v56, 0.0  ;;  %v2018_v35 = vpop.xlane.xlu0 %2017  ;;  %v2072_v56 = vld [vmem:[#allocation8 + $0x18] sm:$0xff] }
 0x2dd   : > { %v2052_v20 = vadd.f32 %v2036_v19, %v2020_v27  ;;  %2152 = vperm.xlu0 %2581, %v2066_v7   ;;  %2117 = vperm.xlu1 %2582, %v2059_v2   ;;  %v2049_v19 = vadd.f32 %v2033_v17, %v2014_v0  ;;  %v2051_v7 = vadd.f32 %v2035_v22, %v2018_v35  ;;  %v2074_v22 = vld [vmem:[#allocation8 + $0x28] sm:$0xff] }
 0x2df   : > { %v2068_v25 = vmax.f32 %v2052_v20, 0.0  ;;  %v2065_v2 = vmax.f32 %v2049_v19, 0.0  ;;  %v2067_v60 = vmax.f32 %v2051_v7, 0.0  ;;  %v2075_v7 = vld [vmem:[#allocation8 + $0x30] sm:$0xff] }
 0x2e1   : > { %2162 = vperm.xlu0 %2581, %v2068_v25   ;;  %2122 = vperm.xlu1 %2582, %v2060_v34   ;;  %v2070_v34 = vld [vmem:[#allocation8 + $0x8] sm:$0xff] }
 0x2e5   : > { %2127 = vperm.xlu1 %2582, %v2061_v49  }
 0x2e9   : > { %2137 = vperm.xlu1 %2582, %v2063_v18  }
 0x2ed   : > { %2147 = vperm.xlu1 %2582, %v2065_v2  }
 0x2f1   : > { %2157 = vperm.xlu1 %2582, %v2067_v60  }
 0x344   : > { %v2088_v25 = vpop.permute.xlu0 %2087 }
 0x345   : > { %v2165_v17 = vmul.f32 %v2088_v25, %v2069_v47  ;;  %v2077_v47 = vld [vmem:[#allocation8 + $0x40] sm:$0xff]  ;;  %v2078_v25 = vld [vmem:[#allocation8 + $0x48] sm:$0xff] }
 0x348   : > { %v2093_v27 = vpop.permute.xlu1 %2092 }
 0x349   : > { %v2166_v0 = vmul.f32 %v2093_v27, %v2070_v34 }
 0x34b   : > { %v2181_v18 = vadd.f32 %v2166_v0, %v2165_v17  ;;  %v2080_v17 = vld [vmem:[#allocation8 + $0x58] sm:$0xff] }
 0x34c   : > { %v2098_v6 = vpop.permute.xlu1 %2097 }
 0x34d   : > { %v2167_v24 = vmul.f32 %v2098_v6, %v2071_v4 }
 0x34f   : > { %v2182_v35 = vadd.f32 %v2181_v18, %v2167_v24  ;;  %v2079_v24 = vld [vmem:[#allocation8 + $0x50] sm:$0xff] }
 0x350   : > { %v2103_v20 = vpop.permute.xlu1 %2102 }
 0x351   : > { %v2168_v19 = vmul.f32 %v2103_v20, %v2072_v56 }
 0x353   : > { %v2183_v62 = vadd.f32 %v2182_v35, %v2168_v19 }
 0x354   : > { %v2108_v49 = vpop.permute.xlu1 %2107  ;;  %v2133_v36 = vpop.permute.xlu0 %2132 }
 0x355   : > { %v2169_v2 = vmul.f32 %v2108_v49, %v2073_v50  ;;  %v2174_v50 = vmul.f32 %v2133_v36, %v2078_v25 }
 0x357   : > { %v2184_v51 = vadd.f32 %v2183_v62, %v2169_v2  ;;  %v2081_v62 = vld [vmem:[#allocation8 + $0x60] sm:$0xff] }
 0x358   : > { %v2113_v39 = vpop.permute.xlu1 %2112  ;;  %v2143_v4 = vpop.permute.xlu0 %2142 }
 0x359   : > { %v2170_v38 = vmul.f32 %v2113_v39, %v2074_v22  ;;  %v2176_v35 = vmul.f32 %v2143_v4, %v2080_v17  ;;  %v2202_v17 = vld [vmem:[%s4363_s10] sm:$0x1] }
 0x35b   : > { %v2185_v27 = vadd.f32 %v2184_v51, %v2170_v38  ;;  %v2082_v51 = vld [vmem:[#allocation8 + $0x68] sm:$0xff]  ;;  %v2083_v38 = vld [vmem:[#allocation8 + $0x70] sm:$0xff] }
 0x35c   : > { %v2118_v60 = vpop.permute.xlu1 %2117  ;;  %v2153_v22 = vpop.permute.xlu0 %2152 }
 0x35d   : > { %v2171_v11 = vmul.f32 %v2118_v60, %v2075_v7  ;;  %v2178_v7 = vmul.f32 %v2153_v22, %v2082_v51 }
 0x35f   : > { %v2186_v6 = vadd.f32 %v2185_v27, %v2171_v11  ;;  %v2084_v27 = vld [vmem:[#allocation8 + $0x78] sm:$0xff] }
 0x360   : > { %v2123_v26 = vpop.permute.xlu1 %2122 }
 0x361   : > { %v2172_v34 = vmul.f32 %v2123_v26, %v2076_v1 }
 0x363   : > { %v2187_v20 = vadd.f32 %v2186_v6, %v2172_v34  ;;  %v2163_v34 = vpop.permute.xlu0 %2162 }
 0x364   : > { %v2128_v0 = vpop.permute.xlu1 %2127  ;;  %v2180_v25 = vmul.f32 %v2163_v34, %v2084_v27  ;;  %v4434_v34 = vmax.f32 %v3912_v55, 0.0 }
 0x365   : > { %v2173_v56 = vmul.f32 %v2128_v0, %v2077_v47 }
 0x367   : > { %v2188_v49 = vadd.f32 %v2187_v20, %v2173_v56 }
 0x368   : > { %v2138_v18 = vpop.permute.xlu1 %2137 }
 0x369   : > { %v2175_v39 = vmul.f32 %v2138_v18, %v2079_v24  ;;  %v2189_v19 = vadd.f32 %v2188_v49, %v2174_v50 }
 0x36b   : > { %v2190_v2 = vadd.f32 %v2189_v19, %v2175_v39 }
 0x36c   : > { %v2148_v26 = vpop.permute.xlu1 %2147 }
 0x36d   : > { %v2177_v1 = vmul.f32 %v2148_v26, %v2081_v62  ;;  %v2191_v11 = vadd.f32 %v2190_v2, %v2176_v35  ;;  %v4431_v2 = vld [vmem:[#allocation15_spill] sm:$0xff] }
 0x36e   : > { %v4432_v51 = vsub.s32 0, %v4431_v2 }
 0x36f   : > { %v2192_v60 = vadd.f32 %v2191_v11, %v2177_v1 }
 0x370   : > { %v2158_v47 = vpop.permute.xlu1 %2157 }
 0x371   : > { %v2179_v36 = vmul.f32 %v2158_v47, %v2083_v38  ;;  %v2193_v6 = vadd.f32 %v2192_v60, %v2178_v7  ;;  %v4433_v60 = vmax.f32 %v3904_v5, 0.0 }
 0x373   : > { %v2194_v0 = vadd.f32 %v2193_v6, %v2179_v36  ;;  %v4435_v36 = vmax.f32 %v3919_v29, 0.0  ;;  %v4441_v29 = vmax.f32 %v3960_v48, 0.0  ;;  %v4445_v48 = vmax.f32 %v3988_v63, 0.0 }
 0x374   : > { %v4449_v63 = vmax.f32 %v4016_v15, 0.0 }
 0x375   : > { %v2195_v20 = vadd.f32 %v2194_v0, %v2180_v25  ;;  %v4444_v25 = vmax.f32 %v3983_v10, 0.0 }
 0x377   : > { %v2196_v56 = vrot.slane %v2195_v20, 4 }
 0x379   : > { %v2197_v24 = vadd.f32 %v2196_v56, %v2195_v20  ;;  %v4447_v56 = vmax.f32 %v4002_v14, 0.0  ;;  %v4451_v14 = vmax.f32 %v4030_v43, 0.0 }
 0x37b   : > { %v2198_v50 = vrot.slane %v2197_v24, 2 }
 0x37d   : > { %v2199_v4 = vadd.f32 %v2198_v50, %v2197_v24  ;;  %v4448_v24 = vmax.f32 %v4011_v8, 0.0  ;;  %v4452_v8 = vmax.f32 %v4039_v57, 0.0  ;;  %v4456_v57 = vmax.f32 %v4066_v42, 0.0 }
 0x37f   : > { %v2200_v49 = vrot.slane %v2199_v4, 1 }
 0x381   : > { %v2201_v18 = vadd.f32 %v2200_v49, %v2199_v4 }
 0x383   : > { %v2203_v39 = vadd.f32 %v2202_v17, %v2201_v18 }
 0x385   : > { %v2410_v19 = vmul.f32 -1.442695, %v2203_v39  ;;  %v4453_v39 = vmax.f32 %v4044_v31, 0.0  ;;  %v4458_v31 = vmax.f32 %v4074_v21, 0.0 }
 0x387   : > { %2591 = vpow2.f32 %v2410_v19  ;;  %v4454_v19 = vmax.f32 %v4053_v41, 0.0 }
 0x391   : > { %v2592_v22 = vpop.eup %2591 }
 0x392   : > { %v2207_v62 = vadd.f32 1.0, %v2592_v22  ;;  %v4455_v22 = vmax.f32 %v4058_v33, 0.0  ;;  %v4459_v33 = vmax.f32 %v4085_v32, 0.0 }
 0x394   : > { %2593 = vrcp.f32 %v2207_v62 }
 0x39e   : > { %v2594_v35 = vpop.eup %2593 }
 0x39f   : > { %v2213_v26 = vrot.slane %v2594_v35, %v4432_v51  ;;  %v4460_v35 = vmax.f32 %v4081_v16, 0.0  ;;  %v4461_v51 = vmax.f32 %v4090_v59, 0.0 }
 0x3a1   : > { %v2214_v1 = vmul.f32 %v2213_v26, %v1886_v58  ;;  %v2215_v11 = vmul.f32 %v2213_v26, %v1887_v9  ;;  %v2216_v38 = vmul.f32 %v2213_v26, %v1888_v37  ;;  %v2217_v7 = vmul.f32 %v2213_v26, %v1889_v52 }
 0x3a2   : > { %v2218_v27 = vmul.f32 %v2213_v26, %v4433_v60  ;;  %v2219_v47 = vmul.f32 %v2213_v26, %v4434_v34  ;;  %v2220_v6 = vmul.f32 %v2213_v26, %v4435_v36  ;;  %v2221_v58 = vmul.f32 %v2213_v26, %v4436_v54 }
 0x3a3   : > { %v2222_v9 = vmul.f32 %v2213_v26, %v4437_v44  ;;  %v2223_v37 = vmul.f32 %v2213_v26, %v4438_v45  ;;  %v2224_v5 = vmul.f32 %v2213_v26, %v4439_v40  ;;  %v4440_v52 = vmax.f32 %v3955_v3, 0.0  ;;  %2246 = vst [vmem:[%s4228_s17] sm:$0xff] %v2214_v1  ;;  %2247 = vst [vmem:[%s4228_s17 + $0x8] sm:$0xff] %v2215_v11 }
 0x3a4   : > { %2248 = vst [vmem:[%s4228_s17 + $0x10] sm:$0xff] %v2216_v38  ;;  %2249 = vst [vmem:[%s4228_s17 + $0x18] sm:$0xff] %v2217_v7  ;;  %v2226_v12 = vmul.f32 %v2213_v26, %v4441_v29  ;;  %v2227_v13 = vmul.f32 %v2213_v26, %v4442_v53  ;;  %v2228_v3 = vmul.f32 %v2213_v26, %v4443_v61 }
 0x3a5   : > { %v2225_v55 = vmul.f32 %v2213_v26, %v4440_v52  ;;  %v2229_v0 = vmul.f32 %v2213_v26, %v4444_v25  ;;  %2250 = vst [vmem:[%s4228_s17 + $0x20] sm:$0xff] %v2218_v27  ;;  %2251 = vst [vmem:[%s4228_s17 + $0x28] sm:$0xff] %v2219_v47  ;;  %v2230_v28 = vmul.f32 %v2213_v26, %v4445_v48 }
 0x3a6   : > { %2252 = vst [vmem:[%s4228_s17 + $0x30] sm:$0xff] %v2220_v6  ;;  %2253 = vst [vmem:[%s4228_s17 + $0x38] sm:$0xff] %v2221_v58  ;;  %v2231_v20 = vmul.f32 %v2213_v26, %v4446_v23  ;;  %v2232_v10 = vmul.f32 %v2213_v26, %v4447_v56  ;;  %v2233_v50 = vmul.f32 %v2213_v26, %v4448_v24 }
 0x3a7   : > { %2254 = vst [vmem:[%s4228_s17 + $0x40] sm:$0xff] %v2222_v9  ;;  %2255 = vst [vmem:[%s4228_s17 + $0x48] sm:$0xff] %v2223_v37  ;;  %v2234_v4 = vmul.f32 %v2213_v26, %v4449_v63  ;;  %v2235_v49 = vmul.f32 %v2213_v26, %v4450_v30  ;;  %v2236_v17 = vmul.f32 %v2213_v26, %v4451_v14 }
 0x3a8   : > { %2256 = vst [vmem:[%s4228_s17 + $0x50] sm:$0xff] %v2224_v5  ;;  %2257 = vst [vmem:[%s4228_s17 + $0x58] sm:$0xff] %v2225_v55  ;;  %v2237_v18 = vmul.f32 %v2213_v26, %v4452_v8  ;;  %v2238_v15 = vmul.f32 %v2213_v26, %v4453_v39  ;;  %v2239_v46 = vmul.f32 %v2213_v26, %v4454_v19 }
 0x3a9   : > { %2258 = vst [vmem:[%s4228_s17 + $0x60] sm:$0xff] %v2226_v12  ;;  %2259 = vst [vmem:[%s4228_s17 + $0x68] sm:$0xff] %v2227_v13  ;;  %v2240_v43 = vmul.f32 %v2213_v26, %v4455_v22  ;;  %v2241_v62 = vmul.f32 %v2213_v26, %v4456_v57  ;;  %v2242_v41 = vmul.f32 %v2213_v26, %v4458_v31 }
 0x3aa   : > { %2260 = vst [vmem:[%s4228_s17 + $0x70] sm:$0xff] %v2228_v3  ;;  %2261 = vst [vmem:[%s4228_s17 + $0x78] sm:$0xff] %v2229_v0  ;;  %v2243_v42 = vmul.f32 %v2213_v26, %v4459_v33  ;;  %v2244_v2 = vmul.f32 %v2213_v26, %v4460_v35  ;;  %v2245_v1 = vmul.f32 %v2213_v26, %v4461_v51 }
 0x3ab   : > { %2262 = vst [vmem:[%s4228_s17 + $0x80] sm:$0xff] %v2230_v28  ;;  %2263 = vst [vmem:[%s4228_s17 + $0x88] sm:$0xff] %v2231_v20 }
 0x3ac   : > { %2264 = vst [vmem:[%s4228_s17 + $0x90] sm:$0xff] %v2232_v10  ;;  %2265 = vst [vmem:[%s4228_s17 + $0x98] sm:$0xff] %v2233_v50 }
 0x3ad   : > { %2266 = vst [vmem:[%s4228_s17 + $0xa0] sm:$0xff] %v2234_v4  ;;  %2267 = vst [vmem:[%s4228_s17 + $0xa8] sm:$0xff] %v2235_v49 }
 0x3ae   : > { %2268 = vst [vmem:[%s4228_s17 + $0xb0] sm:$0xff] %v2236_v17  ;;  %2269 = vst [vmem:[%s4228_s17 + $0xb8] sm:$0xff] %v2237_v18 }
 0x3af   : > { %2270 = vst [vmem:[%s4228_s17 + $0xc0] sm:$0xff] %v2238_v15  ;;  %2271 = vst [vmem:[%s4228_s17 + $0xc8] sm:$0xff] %v2239_v46 }
 0x3b0   : > { %2272 = vst [vmem:[%s4228_s17 + $0xd0] sm:$0xff] %v2240_v43  ;;  %2273 = vst [vmem:[%s4228_s17 + $0xd8] sm:$0xff] %v2241_v62 }
 0x3b1   : > { %2274 = vst [vmem:[%s4228_s17 + $0xe0] sm:$0xff] %v2242_v41  ;;  %2275 = vst [vmem:[%s4228_s17 + $0xe8] sm:$0xff] %v2243_v42 }
 0x3b2   : > { %2276 = vst [vmem:[%s4228_s17 + $0xf0] sm:$0xff] %v2244_v2  ;;  %2277 = vst [vmem:[%s4228_s17 + $0xf8] sm:$0xff] %v2245_v1 }
 0x3b3   : > { %2704 = shalt.err (!%p2701_p2)
}
 0x3b4   : > { %s2705_s27 = scalar_lea.hbm %s4287_s23, 4096  ;;  %s2709_s21 = scalar_lea.hbm %s4457_s15, 8192 }
 0x3b5   : > { %p2706_p13 = scmp.ne.s32.totalorder %s4287_s23, %s2705_s27  ;;  %p2710_p4 = scmp.lt.u32.totalorder %s4287_s23, %s4457_s15 }
 0x3b6   : > { %p2711_p7 = scmp.lt.u32.totalorder %s2709_s21, %s2705_s27  ;;  %p2713_p11 = scmp.lt.u32.totalorder %s2705_s27, %s4287_s23 }
 0x3b7   : > { %p2707_p6 = pnand %p2706_p13, %p4462_p0 }
 0x3b8   : > { %p2712_p8 = por %p2711_p7, %p2710_p4 }
 0x3b9   : > { %p2708_p10 = pneg %p2707_p6 }
 0x3ba   : > { %p2714_p1 = por %p2713_p11, %p2712_p8 }
 0x3bc   : > { %p2715_p3 = pnand %p2714_p1, %p2708_p10 }
 0x3be   : > { %2718 = shalt.err (!%p2715_p3)
}
 0x3bf   : > { %s2773_s11 = smov 128   ;;  %s2774_s14 = smov 8  }
 0x3c0   : > { %2516 = dma.vmem_to_hbm [thread:$0]  (%p4462_p0), %s4289_s29, 4096, %s4287_s23, %s2279_s25, %s2773_s11, %s2773_s11, %s2774_s14  }
 0x3c1 PF: > { %s4463_s30 = sld [smem:[#allocation13_spill]]  ;;  %s4464_s17 = sld [smem:[#allocation14_spill]] }
 0x3c2   : > { %p4466_p9 = scmp.ge.s32.totalorder %s2761_s20, 2 }
 0x3c7   : > { %s2307_s22 = sand.u32 1, %s4463_s30   ;;  %p4465_p5 = scmp.ne.s32.totalorder %s4464_s17, 0 }
 0x3c8   : > { %s2308_s27 = scalar_lea.sflag [#allocation5], %s2307_s22 }
 0x3c9   : > { %p2530_p12 = pnand %p4466_p9, %p4465_p5 }
 0x3cb   : > { %2744 = dma.done.wait (!%p2530_p12), %s2308_s27, 4096  }
 0x3cc   : > { %2746 = vsyncadd (!%p2530_p12), %s2308_s27, 4294963200  ;;  %p25_p2 = scmp.ge.s32.totalorder %s2948_s13, 4   ;;  %s4467_s17 = smov %s2753_s18 }
 0x3cd   : > { %s4468_s18 = smov %s2757_s19  ;;  %s4469_s19 = smov %s2957_s16 }
 0x3ce   : > { %s4470_s20 = smov %s2948_s13  ;;  %27 = sbr.rel (!%p25_p2) target bundleno = 8 (0x8), region = 119 }
 0x3d5   :  { %2313 = vsyncpa [#allocation4], 1 }
 0x3d6   :  { %2315 = vsyncpa [#allocation4 + $0x1], 1 }
 0x3d7   :  { %2316 = vsyncpa [#allocation7], 1 }
 0x3d8   :  { %2317 = vsyncpa [#allocation5], 1 }
 0x3d9   :  { %2319 = vsyncpa [#allocation5 + $0x1], 1 }

</bundles_post_ra>
